<compile_context>
chip_gen: v5e
topology: v5e:2x2
jax: 0.10.0
libtpu: 0.0.40
codegen_flags: <defaults>
</compile_context>

<pallas_src>
import numpy as np
import jax
import jax.numpy as jnp
from jax import lax
from jax.experimental import pallas as pl
from jax.experimental.pallas import tpu as pltpu


# ----------------------------- config (small) -------------------------------
NFEATURE   = 6
NF_PAD     = 16                             # feature dim zero-padded (bf16 sublane tile)
NDIM       = 32
N_HEAD     = 4
N_LAYER    = 2
BLOCK_SIZE = 16
TARGET_DIM = 4
DY_MASK    = [1.0, 0.0, 1.0, 0.0]           # len == TARGET_DIM
K_REPARAM  = 1.0
B, T       = 2, 8                           # batch, sequence length (T <= BLOCK_SIZE)
BT         = B * T

LN_EPS  = 1e-5
GELU_C  = float(np.sqrt(2.0 / np.pi))
NEG_BIG = -1e30                             # finite mask value (avoids -inf NaN hazard)

assert NDIM % N_HEAD == 0
HEAD_DIM = NDIM // N_HEAD

# row offsets inside the packed slabs (all multiples of 16 -> clean bf16 tiles)
W32_INIT = 0                                # fc_init weight        (NF_PAD, 32)
W32_PROJ = NF_PAD                           # attn c_proj weights   (32, 32) per layer
W32_PW   = W32_PROJ + N_LAYER * NDIM        # mlp c_proj weights    (128, 32) per layer
W32_OUT  = W32_PW + N_LAYER * 4 * NDIM      # fc_out weight (padded to 32 lanes)
W32_ROWS = W32_OUT + NDIM

VR0          = 7                            # first per-layer row of the f32 vec slab
VR_PER_LAYER = 9                            # ln1w,ln1b,bq,bk,bv,projb,ln2w,ln2b,mlpb


# ------------------------------ fused kernel --------------------------------
def _layer_norm(x, w, b):
    # one-pass: the two reductions are independent and overlap in the XLU
    mu = jnp.mean(x, axis=-1, keepdims=True)
    ms = jnp.mean(x * x, axis=-1, keepdims=True)
    var = ms - mu * mu
    return (x - mu) * lax.rsqrt(var + LN_EPS) * w + b


def mynet_kernel(x_ref, vec32_ref, vec128_ref, w96_ref, w32_ref, wfc_ref,
                 theta_ref, pen_ref):
    f32, bf16 = jnp.float32, jnp.bfloat16
    C, H, hd = NDIM, N_HEAD, HEAD_DIM
    scale = 1.0 / float(np.sqrt(hd))

    # ---- one-time unpack of the small f32 vectors ----
    fc_init_b = vec32_ref[0]
    lnf_w, lnf_b = vec32_ref[1], vec32_ref[2]
    mask_d = vec32_ref[3][:TARGET_DIM]
    mask_c = vec32_ref[4][:TARGET_DIM]
    lo     = vec32_ref[5][:TARGET_DIM]
    span   = vec32_ref[6][:TARGET_DIM]
    att_bias = vec128_ref[0:BT, :][:, 0:BT]          # (BT, BT) additive causal mask

    # ---- fc_init: one (BT, NF_PAD) @ (NF_PAD, C) matmul ----
    x = jnp.dot(x_ref[...].astype(bf16), w32_ref[W32_INIT:W32_INIT + NF_PAD, :],
                preferred_element_type=f32) + fc_init_b
    # transformer.drop: identity (inference / dropout = 0)

    # ---- transformer blocks (statically unrolled, N_LAYER = 2) ----
    for l in range(N_LAYER):
        r = VR0 + VR_PER_LAYER * l
        ln1_w, ln1_b = vec32_ref[r + 0], vec32_ref[r + 1]
        bq, bk, bv   = vec32_ref[r + 2], vec32_ref[r + 3], vec32_ref[r + 4]
        proj_b       = vec32_ref[r + 5]
        ln2_w, ln2_b = vec32_ref[r + 6], vec32_ref[r + 7]
        mlp_b        = vec32_ref[r + 8]
        fc_b         = vec128_ref[BT + l]

        # -- ln_1 + causal self-attention --
        xn = _layer_norm(x, ln1_w, ln1_b)
        # fused qkv projection: ONE MXU push instead of 3*H tiny per-head ones
        qkv = jnp.dot(xn.astype(bf16), w96_ref[C * l:C * (l + 1), :],
                      preferred_element_type=f32)               # (BT, 3C) f32
        qb = ((qkv[:, 0:C] + bq) * scale).astype(bf16)          # scale folded into q
        kb = (qkv[:, C:2 * C] + bk).astype(bf16)
        vb = (qkv[:, 2 * C:3 * C] + bv).astype(bf16)

        ys = []
        for h in range(H):                                      # static unroll, H = 4
            sl = slice(h * hd, (h + 1) * hd)
            s = jnp.einsum('qd,kd->qk', qb[:, sl], kb[:, sl],
                           preferred_element_type=f32) + att_bias
            s = s - jnp.max(s, axis=-1, keepdims=True)
            p = jnp.exp(s)
            p = p * pl.reciprocal(jnp.sum(p, axis=-1, keepdims=True), approx=True)
            ys.append(jnp.dot(p.astype(bf16), vb[:, sl],
                              preferred_element_type=f32))      # (BT, hd)
        y = jnp.concatenate(ys, axis=1)                         # head concat -> (BT, C)

        # output projection: ONE (BT,C)@(C,C) matmul (== concat-of-heads @ Wproj)
        pr = W32_PROJ + C * l
        x = x + jnp.dot(y.astype(bf16), w32_ref[pr:pr + C, :],
                        preferred_element_type=f32) + proj_b    # residual 1

        # -- ln_2 + MLP (new_gelu) --
        xn2 = _layer_norm(x, ln2_w, ln2_b)
        h1 = jnp.dot(xn2.astype(bf16), wfc_ref[C * l:C * (l + 1), :],
                     preferred_element_type=f32) + fc_b         # (BT, 4C)
        g = 0.5 * h1 * (1.0 + jnp.tanh(GELU_C * (h1 + 0.044715 * h1 * h1 * h1)))
        pw_r = W32_PW + 4 * C * l
        x = x + jnp.dot(g.astype(bf16), w32_ref[pw_r:pw_r + 4 * C, :],
                        preferred_element_type=f32) + mlp_b     # residual 2

    # ---- final LayerNorm + fc_out (no bias) ----
    xf = _layer_norm(x, lnf_w, lnf_b)
    out = jnp.dot(xf.astype(bf16), w32_ref[W32_OUT:W32_OUT + C, :],
                  preferred_element_type=f32)[:, 0:TARGET_DIM]  # (BT, D)

    # ---- fused post-processing: dy_mask mixing, loss_pen, sigmoid reparam ----
    xc_parts = []
    for b in range(B):                                          # static, B = 2 (cheap means)
        m = jnp.mean(out[b * T:(b + 1) * T, :], axis=0, keepdims=True)
        xc_parts.append(jnp.broadcast_to(m, (T, TARGET_DIM)))
    xc = jnp.concatenate(xc_parts, axis=0)                      # (BT, D) per-batch time-mean
    xraw = out * mask_d + xc * mask_c

    pen = jnp.zeros((TARGET_DIM,), f32)
    for b in range(B):                                          # per-batch time diffs
        r0, r1 = b * T, (b + 1) * T
        pen = pen + jnp.sum(jnp.abs(xraw[r0 + 1:r1, :] - xraw[r0:r1 - 1, :]), axis=0)
    pen_ref[...] = (pen / float(B * (T - 1)))[None, :]

    # TODO(synk): raw2theta_torch was not provided; assumed standard sigmoid
    # reparameterization theta = lo + (hi - lo) * sigmoid(k * theta_raw).
    sig = pl.reciprocal(1.0 + jnp.exp(-K_REPARAM * xraw), approx=True)
    theta_ref[...] = lo + span * sig                            # single full-ref store


# --------------------------- pallas wrapper ----------------------------------
def _full_spec(shape):
    zeros = (0,) * len(shape)
    return pl.BlockSpec(shape, lambda i, _z=zeros: _z)


def fused_forward(xin, packed):
    """xin: (BT, NF_PAD) f32; packed: dict of packed parameter slabs."""
    operands = (xin, packed["vec32"], packed["vec128"], packed["w96"],
                packed["w32"], packed["wfc"])
    return pl.pallas_call(
        mynet_kernel,
        out_shape=(jax.ShapeDtypeStruct((BT, TARGET_DIM), jnp.float32),
                   jax.ShapeDtypeStruct((1, TARGET_DIM), jnp.float32)),
        grid=(1,),
        in_specs=[_full_spec(op.shape) for op in operands],
        out_specs=(_full_spec((BT, TARGET_DIM)), _full_spec((1, TARGET_DIM))),
        compiler_params=pltpu.CompilerParams(
            dimension_semantics=("arbitrary",)),
    )(*operands)


def forward(inputs, packed):
    Bb, Tt, nf = inputs.shape
    assert Tt <= BLOCK_SIZE
    xin = jnp.pad(inputs.reshape(Bb * Tt, nf), ((0, 0), (0, NF_PAD - nf)))
    theta2d, pen = fused_forward(xin, packed)
    return theta2d.reshape(Bb, Tt, TARGET_DIM), pen[0]


# ---------------------------- parameter init ---------------------------------
def init_params(key):
    """Deterministic init matching myNet._init_weights conventions."""
    std = 0.02
    std_proj = 0.02 / np.sqrt(2 * N_LAYER)
    keys = iter(jax.random.split(key, 64))
    nrm = lambda shape, s: (s * jax.random.normal(next(keys), shape)).astype(jnp.float32)
    zeros = lambda *shape: jnp.zeros(shape, jnp.float32)
    ones = lambda *shape: jnp.ones(shape, jnp.float32)

    params = {
        "fc_init_w": nrm((NFEATURE, NDIM), std),        # pre-transposed (in, out)
        "fc_init_b": zeros(NDIM),
        "lnf_w": ones(NDIM), "lnf_b": zeros(NDIM),
        "fc_out_w": nrm((NDIM, TARGET_DIM), std),
        "blocks": [],
    }
    for _ in range(N_LAYER):
        params["blocks"].append(dict(
            ln1_w=ones(NDIM), ln1_b=zeros(NDIM),
            attn_w=nrm((NDIM, 3 * NDIM), std), attn_b=zeros(3 * NDIM),
            proj_w=nrm((NDIM, NDIM), std_proj), proj_b=zeros(NDIM),
            ln2_w=ones(NDIM), ln2_b=zeros(NDIM),
            fc_w=nrm((NDIM, 4 * NDIM), std), fc_b=zeros(4 * NDIM),
            mlpproj_w=nrm((4 * NDIM, NDIM), std_proj), mlpproj_b=zeros(NDIM),
        ))
    return params


def pack_params(params, prior_bds):
    """Pack all parameters into 5 slabs (one-time, outside jit).

    vec32  (f32, (7+9L, 32)) : biases / LN vectors / dy-mask / prior bounds
    vec128 (f32, (BT+L, 128)): additive causal mask rows + mlp c_fc biases
    w96    (bf16, (32L, 96)) : fused qkv weights, one 32-row block per layer
    w32    (bf16, (·, 32))   : fc_init | attn c_proj | mlp c_proj | fc_out (padded)
    wfc    (bf16, (32L, 128)): mlp c_fc weights
    """
    C = NDIM
    f32, bf16 = jnp.float32, jnp.bfloat16
    pad32 = lambda v: jnp.pad(jnp.asarray(v, f32), (0, C - int(np.shape(v)[0])))
    dy = jnp.asarray(DY_MASK, f32)

    rows = [params["fc_init_b"], params["lnf_w"], params["lnf_b"],
            pad32(dy), pad32(1.0 - dy),
            pad32(prior_bds[:, 0]), pad32(prior_bds[:, 1] - prior_bds[:, 0])]
    for blk in params["blocks"]:
        ab = blk["attn_b"]
        rows += [blk["ln1_w"], blk["ln1_b"], ab[0:C], ab[C:2 * C], ab[2 * C:3 * C],
                 blk["proj_b"], blk["ln2_w"], blk["ln2_b"], blk["mlpproj_b"]]
    vec32 = jnp.stack(rows, 0)

    # additive causal mask, block-diagonal across the folded batch dim (rows = b*T+t)
    idx = np.arange(BT)
    allow = (idx[None, :] <= idx[:, None]) & (idx[None, :] // T == idx[:, None] // T)
    bias = np.where(allow, 0.0, NEG_BIG).astype(np.float32)
    bias = np.pad(bias, ((0, 0), (0, 128 - BT)))
    vec128 = jnp.concatenate(
        [jnp.asarray(bias),
         jnp.stack([blk["fc_b"] for blk in params["blocks"]], 0)], 0)

    w96 = jnp.concatenate([blk["attn_w"] for blk in params["blocks"]], 0).astype(bf16)
    wfc = jnp.concatenate([blk["fc_w"] for blk in params["blocks"]], 0).astype(bf16)
    w_init_pad = jnp.pad(params["fc_init_w"], ((0, NF_PAD - NFEATURE), (0, 0)))
    w_out_pad = jnp.pad(params["fc_out_w"], ((0, 0), (0, C - TARGET_DIM)))
    w32 = jnp.concatenate(
        [w_init_pad]
        + [blk["proj_w"] for blk in params["blocks"]]
        + [blk["mlpproj_w"] for blk in params["blocks"]]
        + [w_out_pad], 0).astype(bf16)
    assert w32.shape[0] == W32_ROWS

    return dict(vec32=vec32, vec128=vec128, w96=w96, w32=w32, wfc=wfc)


# ---------------------------------- main --------------------------------------
if __name__ == "__main__":
    root = jax.random.PRNGKey(0)
    k_in, k_params = jax.random.split(root)

    inputs = jax.random.normal(k_in, (B, T, NFEATURE), dtype=jnp.float32)
    params = init_params(k_params)
    prior_bds = jnp.array([[0.0, 1.0],
                           [0.0, 2.0],
                           [-1.0, 1.0],
                           [0.0, 5.0]], dtype=jnp.float32)   # (target_dim, 2)
    packed = pack_params(params, prior_bds)

    fwd = jax.jit(forward)
    theta, loss_pen = fwd(inputs, packed)
    jax.block_until_ready((theta, loss_pen))

    assert theta.shape == (B, T, TARGET_DIM)
    assert loss_pen.shape == (TARGET_DIM,)
    assert bool(jnp.all(jnp.isfinite(theta))) and bool(jnp.all(jnp.isfinite(loss_pen)))
    print("KERNEL_OK")
</pallas_src>

<mosaic_0001>
module attributes {stable_mosaic.version = 11 : i64} {
  func.func @mynet_kernel(%arg0: i32, %arg1: memref<16x16xf32, #tpu.memory_space<vmem>>, %arg2: memref<25x32xf32, #tpu.memory_space<vmem>>, %arg3: memref<18x128xf32, #tpu.memory_space<vmem>>, %arg4: memref<64x96xbf16, #tpu.memory_space<vmem>>, %arg5: memref<368x32xbf16, #tpu.memory_space<vmem>>, %arg6: memref<64x128xbf16, #tpu.memory_space<vmem>>, %arg7: memref<16x4xf32, #tpu.memory_space<vmem>>, %arg8: memref<1x4xf32, #tpu.memory_space<vmem>>) attributes {dimension_semantics = [#tpu.dimension_semantics<arbitrary>], iteration_bounds = array<i64: 1>, scalar_prefetch = 0 : i64, scratch_operands = 0 : i64, tpu.core_type = #tpu.core_type<tc>, window_params = [{pipeline_mode = #tpu.pipeline_mode<synchronous>, transform_indices = @transform_0, window_bounds = array<i64: 16, 16>}, {pipeline_mode = #tpu.pipeline_mode<synchronous>, transform_indices = @transform_1, window_bounds = array<i64: 25, 32>}, {pipeline_mode = #tpu.pipeline_mode<synchronous>, transform_indices = @transform_2, window_bounds = array<i64: 18, 128>}, {pipeline_mode = #tpu.pipeline_mode<synchronous>, transform_indices = @transform_3, window_bounds = array<i64: 64, 96>}, {pipeline_mode = #tpu.pipeline_mode<synchronous>, transform_indices = @transform_4, window_bounds = array<i64: 368, 32>}, {pipeline_mode = #tpu.pipeline_mode<synchronous>, transform_indices = @transform_5, window_bounds = array<i64: 64, 128>}, {pipeline_mode = #tpu.pipeline_mode<synchronous>, transform_indices = @transform_6, window_bounds = array<i64: 16, 4>}, {pipeline_mode = #tpu.pipeline_mode<synchronous>, transform_indices = @transform_7, window_bounds = array<i64: 1, 4>}]} {
    %c0 = arith.constant 0 : index
    %c0_0 = arith.constant 0 : index
    %0 = vector.load %arg2[%c0, %c0_0] : memref<25x32xf32, #tpu.memory_space<vmem>>, vector<1x32xf32>
    %1 = vector.shape_cast %0 : vector<1x32xf32> to vector<32xf32>
    %c1 = arith.constant 1 : index
    %c0_1 = arith.constant 0 : index
    %2 = vector.load %arg2[%c1, %c0_1] : memref<25x32xf32, #tpu.memory_space<vmem>>, vector<1x32xf32>
    %3 = vector.shape_cast %2 : vector<1x32xf32> to vector<32xf32>
    %c2 = arith.constant 2 : index
    %c0_2 = arith.constant 0 : index
    %4 = vector.load %arg2[%c2, %c0_2] : memref<25x32xf32, #tpu.memory_space<vmem>>, vector<1x32xf32>
    %5 = vector.shape_cast %4 : vector<1x32xf32> to vector<32xf32>
    %c3 = arith.constant 3 : index
    %c0_3 = arith.constant 0 : index
    %6 = vector.load %arg2[%c3, %c0_3] : memref<25x32xf32, #tpu.memory_space<vmem>>, vector<1x32xf32>
    %7 = vector.shape_cast %6 : vector<1x32xf32> to vector<32xf32>
    %8 = vector.extract_strided_slice %7 {offsets = [0], sizes = [4], strides = [1]} : vector<32xf32> to vector<4xf32>
    %c4 = arith.constant 4 : index
    %c0_4 = arith.constant 0 : index
    %9 = vector.load %arg2[%c4, %c0_4] : memref<25x32xf32, #tpu.memory_space<vmem>>, vector<1x32xf32>
    %10 = vector.shape_cast %9 : vector<1x32xf32> to vector<32xf32>
    %11 = vector.extract_strided_slice %10 {offsets = [0], sizes = [4], strides = [1]} : vector<32xf32> to vector<4xf32>
    %c5 = arith.constant 5 : index
    %c0_5 = arith.constant 0 : index
    %12 = vector.load %arg2[%c5, %c0_5] : memref<25x32xf32, #tpu.memory_space<vmem>>, vector<1x32xf32>
    %13 = vector.shape_cast %12 : vector<1x32xf32> to vector<32xf32>
    %14 = vector.extract_strided_slice %13 {offsets = [0], sizes = [4], strides = [1]} : vector<32xf32> to vector<4xf32>
    %c6 = arith.constant 6 : index
    %c0_6 = arith.constant 0 : index
    %15 = vector.load %arg2[%c6, %c0_6] : memref<25x32xf32, #tpu.memory_space<vmem>>, vector<1x32xf32>
    %16 = vector.shape_cast %15 : vector<1x32xf32> to vector<32xf32>
    %17 = vector.extract_strided_slice %16 {offsets = [0], sizes = [4], strides = [1]} : vector<32xf32> to vector<4xf32>
    %c0_7 = arith.constant 0 : index
    %c0_8 = arith.constant 0 : index
    %18 = vector.load %arg3[%c0_7, %c0_8] : memref<18x128xf32, #tpu.memory_space<vmem>>, vector<16x128xf32>
    %19 = vector.extract_strided_slice %18 {offsets = [0, 0], sizes = [16, 16], strides = [1, 1]} : vector<16x128xf32> to vector<16x16xf32>
    %c0_9 = arith.constant 0 : index
    %c0_10 = arith.constant 0 : index
    %20 = vector.load %arg1[%c0_9, %c0_10] : memref<16x16xf32, #tpu.memory_space<vmem>>, vector<16x16xf32>
    %21 = arith.truncf %20 : vector<16x16xf32> to vector<16x16xbf16>
    %c0_11 = arith.constant 0 : index
    %c0_12 = arith.constant 0 : index
    %22 = vector.load %arg5[%c0_11, %c0_12] : memref<368x32xbf16, #tpu.memory_space<vmem>>, vector<16x32xbf16>
    %cst = arith.constant dense<0.000000e+00> : vector<16x32xf32>
    %23 = tpu.matmul %21, %22, %cst {dimension_numbers = #tpu.dot_dimension_numbers<[1], [0], [0], [1], [0, 0, 1, 1], [], []>} : vector<16x16xbf16>, vector<16x32xbf16>, vector<16x32xf32> -> vector<16x32xf32>
    %24 = vector.shape_cast %1 : vector<32xf32> to vector<1x32xf32>
    %25 = vector.broadcast %24 : vector<1x32xf32> to vector<16x32xf32>
    %26 = arith.addf %23, %25 : vector<16x32xf32>
    %c7 = arith.constant 7 : index
    %c0_13 = arith.constant 0 : index
    %27 = vector.load %arg2[%c7, %c0_13] : memref<25x32xf32, #tpu.memory_space<vmem>>, vector<1x32xf32>
    %28 = vector.shape_cast %27 : vector<1x32xf32> to vector<32xf32>
    %c8 = arith.constant 8 : index
    %c0_14 = arith.constant 0 : index
    %29 = vector.load %arg2[%c8, %c0_14] : memref<25x32xf32, #tpu.memory_space<vmem>>, vector<1x32xf32>
    %30 = vector.shape_cast %29 : vector<1x32xf32> to vector<32xf32>
    %c9 = arith.constant 9 : index
    %c0_15 = arith.constant 0 : index
    %31 = vector.load %arg2[%c9, %c0_15] : memref<25x32xf32, #tpu.memory_space<vmem>>, vector<1x32xf32>
    %32 = vector.shape_cast %31 : vector<1x32xf32> to vector<32xf32>
    %c10 = arith.constant 10 : index
    %c0_16 = arith.constant 0 : index
    %33 = vector.load %arg2[%c10, %c0_16] : memref<25x32xf32, #tpu.memory_space<vmem>>, vector<1x32xf32>
    %34 = vector.shape_cast %33 : vector<1x32xf32> to vector<32xf32>
    %c11 = arith.constant 11 : index
    %c0_17 = arith.constant 0 : index
    %35 = vector.load %arg2[%c11, %c0_17] : memref<25x32xf32, #tpu.memory_space<vmem>>, vector<1x32xf32>
    %36 = vector.shape_cast %35 : vector<1x32xf32> to vector<32xf32>
    %c12 = arith.constant 12 : index
    %c0_18 = arith.constant 0 : index
    %37 = vector.load %arg2[%c12, %c0_18] : memref<25x32xf32, #tpu.memory_space<vmem>>, vector<1x32xf32>
    %38 = vector.shape_cast %37 : vector<1x32xf32> to vector<32xf32>
    %c13 = arith.constant 13 : index
    %c0_19 = arith.constant 0 : index
    %39 = vector.load %arg2[%c13, %c0_19] : memref<25x32xf32, #tpu.memory_space<vmem>>, vector<1x32xf32>
    %40 = vector.shape_cast %39 : vector<1x32xf32> to vector<32xf32>
    %c14 = arith.constant 14 : index
    %c0_20 = arith.constant 0 : index
    %41 = vector.load %arg2[%c14, %c0_20] : memref<25x32xf32, #tpu.memory_space<vmem>>, vector<1x32xf32>
    %42 = vector.shape_cast %41 : vector<1x32xf32> to vector<32xf32>
    %c15 = arith.constant 15 : index
    %c0_21 = arith.constant 0 : index
    %43 = vector.load %arg2[%c15, %c0_21] : memref<25x32xf32, #tpu.memory_space<vmem>>, vector<1x32xf32>
    %44 = vector.shape_cast %43 : vector<1x32xf32> to vector<32xf32>
    %c16 = arith.constant 16 : index
    %c0_22 = arith.constant 0 : index
    %45 = vector.load %arg3[%c16, %c0_22] : memref<18x128xf32, #tpu.memory_space<vmem>>, vector<1x128xf32>
    %46 = vector.shape_cast %45 : vector<1x128xf32> to vector<128xf32>
    %cst_23 = arith.constant dense<0.000000e+00> : vector<16xf32>
    %47 = vector.multi_reduction <add>, %26, %cst_23 [1] : vector<16x32xf32> to vector<16xf32>
    %48 = vector.shape_cast %47 : vector<16xf32> to vector<16x1xf32>
    %cst_24 = arith.constant 3.200000e+01 : f32
    %49 = vector.broadcast %cst_24 : f32 to vector<16x1xf32>
    %50 = arith.divf %48, %49 : vector<16x1xf32>
    %51 = arith.mulf %26, %26 : vector<16x32xf32>
    %cst_25 = arith.constant dense<0.000000e+00> : vector<16xf32>
    %52 = vector.multi_reduction <add>, %51, %cst_25 [1] : vector<16x32xf32> to vector<16xf32>
    %53 = vector.shape_cast %52 : vector<16xf32> to vector<16x1xf32>
    %cst_26 = arith.constant 3.200000e+01 : f32
    %54 = vector.broadcast %cst_26 : f32 to vector<16x1xf32>
    %55 = arith.divf %53, %54 : vector<16x1xf32>
    %56 = arith.mulf %50, %50 : vector<16x1xf32>
    %57 = arith.subf %55, %56 : vector<16x1xf32>
    %58 = vector.broadcast %50 : vector<16x1xf32> to vector<16x32xf32>
    %59 = arith.subf %26, %58 : vector<16x32xf32>
    %cst_27 = arith.constant 9.99999974E-6 : f32
    %60 = vector.broadcast %cst_27 : f32 to vector<16x1xf32>
    %61 = arith.addf %57, %60 : vector<16x1xf32>
    %62 = math.rsqrt %61 : vector<16x1xf32>
    %63 = vector.broadcast %62 : vector<16x1xf32> to vector<16x32xf32>
    %64 = arith.mulf %59, %63 : vector<16x32xf32>
    %65 = vector.shape_cast %28 : vector<32xf32> to vector<1x32xf32>
    %66 = vector.broadcast %65 : vector<1x32xf32> to vector<16x32xf32>
    %67 = arith.mulf %64, %66 : vector<16x32xf32>
    %68 = vector.shape_cast %30 : vector<32xf32> to vector<1x32xf32>
    %69 = vector.broadcast %68 : vector<1x32xf32> to vector<16x32xf32>
    %70 = arith.addf %67, %69 : vector<16x32xf32>
    %71 = arith.truncf %70 : vector<16x32xf32> to vector<16x32xbf16>
    %c0_28 = arith.constant 0 : index
    %c0_29 = arith.constant 0 : index
    %72 = vector.load %arg4[%c0_28, %c0_29] : memref<64x96xbf16, #tpu.memory_space<vmem>>, vector<32x96xbf16>
    %cst_30 = arith.constant dense<0.000000e+00> : vector<16x96xf32>
    %73 = tpu.matmul %71, %72, %cst_30 {dimension_numbers = #tpu.dot_dimension_numbers<[1], [0], [0], [1], [0, 0, 1, 1], [], []>} : vector<16x32xbf16>, vector<32x96xbf16>, vector<16x96xf32> -> vector<16x96xf32>
    %74 = vector.extract_strided_slice %73 {offsets = [0, 0], sizes = [16, 32], strides = [1, 1]} : vector<16x96xf32> to vector<16x32xf32>
    %75 = vector.shape_cast %32 : vector<32xf32> to vector<1x32xf32>
    %76 = vector.broadcast %75 : vector<1x32xf32> to vector<16x32xf32>
    %77 = arith.addf %74, %76 : vector<16x32xf32>
    %cst_31 = arith.constant 0.353553385 : f32
    %78 = vector.broadcast %cst_31 : f32 to vector<16x32xf32>
    %79 = arith.mulf %77, %78 : vector<16x32xf32>
    %80 = arith.truncf %79 : vector<16x32xf32> to vector<16x32xbf16>
    %81 = vector.extract_strided_slice %73 {offsets = [0, 32], sizes = [16, 32], strides = [1, 1]} : vector<16x96xf32> to vector<16x32xf32>
    %82 = vector.shape_cast %34 : vector<32xf32> to vector<1x32xf32>
    %83 = vector.broadcast %82 : vector<1x32xf32> to vector<16x32xf32>
    %84 = arith.addf %81, %83 : vector<16x32xf32>
    %85 = arith.truncf %84 : vector<16x32xf32> to vector<16x32xbf16>
    %86 = vector.extract_strided_slice %73 {offsets = [0, 64], sizes = [16, 32], strides = [1, 1]} : vector<16x96xf32> to vector<16x32xf32>
    %87 = vector.shape_cast %36 : vector<32xf32> to vector<1x32xf32>
    %88 = vector.broadcast %87 : vector<1x32xf32> to vector<16x32xf32>
    %89 = arith.addf %86, %88 : vector<16x32xf32>
    %90 = arith.truncf %89 : vector<16x32xf32> to vector<16x32xbf16>
    %91 = vector.extract_strided_slice %80 {offsets = [0, 0], sizes = [16, 8], strides = [1, 1]} : vector<16x32xbf16> to vector<16x8xbf16>
    %92 = vector.extract_strided_slice %85 {offsets = [0, 0], sizes = [16, 8], strides = [1, 1]} : vector<16x32xbf16> to vector<16x8xbf16>
    "tpu.trace_start"() <{level = 10 : i32, message = "qd,kd->qk"}> : () -> ()
    %cst_32 = arith.constant dense<0.000000e+00> : vector<16x16xf32>
    %93 = tpu.matmul %91, %92, %cst_32 {dimension_numbers = #tpu.dot_dimension_numbers<[1], [1], [0], [0], [0, 0, 1, 0], [], []>} : vector<16x8xbf16>, vector<16x8xbf16>, vector<16x16xf32> -> vector<16x16xf32>
    "tpu.trace_stop"() : () -> ()
    %94 = arith.addf %93, %19 : vector<16x16xf32>
    %cst_33 = arith.constant dense<0xFF800000> : vector<16xf32>
    %95 = vector.multi_reduction <maximumf>, %94, %cst_33 [1] : vector<16x16xf32> to vector<16xf32>
    %96 = vector.shape_cast %95 : vector<16xf32> to vector<16x1xf32>
    %97 = vector.broadcast %96 : vector<16x1xf32> to vector<16x16xf32>
    %98 = arith.subf %94, %97 : vector<16x16xf32>
    %99 = math.exp %98 : vector<16x16xf32>
    %cst_34 = arith.constant dense<0.000000e+00> : vector<16xf32>
    %100 = vector.multi_reduction <add>, %99, %cst_34 [1] : vector<16x16xf32> to vector<16xf32>
    %101 = vector.shape_cast %100 : vector<16xf32> to vector<16x1xf32>
    %102 = tpu.reciprocal %101 {approx = true} : vector<16x1xf32> -> vector<16x1xf32>
    %103 = vector.broadcast %102 : vector<16x1xf32> to vector<16x16xf32>
    %104 = arith.mulf %99, %103 : vector<16x16xf32>
    %105 = arith.truncf %104 : vector<16x16xf32> to vector<16x16xbf16>
    %106 = vector.extract_strided_slice %90 {offsets = [0, 0], sizes = [16, 8], strides = [1, 1]} : vector<16x32xbf16> to vector<16x8xbf16>
    %cst_35 = arith.constant dense<0.000000e+00> : vector<16x8xf32>
    %107 = tpu.matmul %105, %106, %cst_35 {dimension_numbers = #tpu.dot_dimension_numbers<[1], [0], [0], [1], [0, 0, 1, 1], [], []>} : vector<16x16xbf16>, vector<16x8xbf16>, vector<16x8xf32> -> vector<16x8xf32>
    %108 = vector.extract_strided_slice %80 {offsets = [0, 8], sizes = [16, 8], strides = [1, 1]} : vector<16x32xbf16> to vector<16x8xbf16>
    %109 = vector.extract_strided_slice %85 {offsets = [0, 8], sizes = [16, 8], strides = [1, 1]} : vector<16x32xbf16> to vector<16x8xbf16>
    "tpu.trace_start"() <{level = 10 : i32, message = "qd,kd->qk"}> : () -> ()
    %cst_36 = arith.constant dense<0.000000e+00> : vector<16x16xf32>
    %110 = tpu.matmul %108, %109, %cst_36 {dimension_numbers = #tpu.dot_dimension_numbers<[1], [1], [0], [0], [0, 0, 1, 0], [], []>} : vector<16x8xbf16>, vector<16x8xbf16>, vector<16x16xf32> -> vector<16x16xf32>
    "tpu.trace_stop"() : () -> ()
    %111 = arith.addf %110, %19 : vector<16x16xf32>
    %cst_37 = arith.constant dense<0xFF800000> : vector<16xf32>
    %112 = vector.multi_reduction <maximumf>, %111, %cst_37 [1] : vector<16x16xf32> to vector<16xf32>
    %113 = vector.shape_cast %112 : vector<16xf32> to vector<16x1xf32>
    %114 = vector.broadcast %113 : vector<16x1xf32> to vector<16x16xf32>
    %115 = arith.subf %111, %114 : vector<16x16xf32>
    %116 = math.exp %115 : vector<16x16xf32>
    %cst_38 = arith.constant dense<0.000000e+00> : vector<16xf32>
    %117 = vector.multi_reduction <add>, %116, %cst_38 [1] : vector<16x16xf32> to vector<16xf32>
    %118 = vector.shape_cast %117 : vector<16xf32> to vector<16x1xf32>
    %119 = tpu.reciprocal %118 {approx = true} : vector<16x1xf32> -> vector<16x1xf32>
    %120 = vector.broadcast %119 : vector<16x1xf32> to vector<16x16xf32>
    %121 = arith.mulf %116, %120 : vector<16x16xf32>
    %122 = arith.truncf %121 : vector<16x16xf32> to vector<16x16xbf16>
    %123 = vector.extract_strided_slice %90 {offsets = [0, 8], sizes = [16, 8], strides = [1, 1]} : vector<16x32xbf16> to vector<16x8xbf16>
    %cst_39 = arith.constant dense<0.000000e+00> : vector<16x8xf32>
    %124 = tpu.matmul %122, %123, %cst_39 {dimension_numbers = #tpu.dot_dimension_numbers<[1], [0], [0], [1], [0, 0, 1, 1], [], []>} : vector<16x16xbf16>, vector<16x8xbf16>, vector<16x8xf32> -> vector<16x8xf32>
    %125 = vector.extract_strided_slice %80 {offsets = [0, 16], sizes = [16, 8], strides = [1, 1]} : vector<16x32xbf16> to vector<16x8xbf16>
    %126 = vector.extract_strided_slice %85 {offsets = [0, 16], sizes = [16, 8], strides = [1, 1]} : vector<16x32xbf16> to vector<16x8xbf16>
    "tpu.trace_start"() <{level = 10 : i32, message = "qd,kd->qk"}> : () -> ()
    %cst_40 = arith.constant dense<0.000000e+00> : vector<16x16xf32>
    %127 = tpu.matmul %125, %126, %cst_40 {dimension_numbers = #tpu.dot_dimension_numbers<[1], [1], [0], [0], [0, 0, 1, 0], [], []>} : vector<16x8xbf16>, vector<16x8xbf16>, vector<16x16xf32> -> vector<16x16xf32>
    "tpu.trace_stop"() : () -> ()
    %128 = arith.addf %127, %19 : vector<16x16xf32>
    %cst_41 = arith.constant dense<0xFF800000> : vector<16xf32>
    %129 = vector.multi_reduction <maximumf>, %128, %cst_41 [1] : vector<16x16xf32> to vector<16xf32>
    %130 = vector.shape_cast %129 : vector<16xf32> to vector<16x1xf32>
    %131 = vector.broadcast %130 : vector<16x1xf32> to vector<16x16xf32>
    %132 = arith.subf %128, %131 : vector<16x16xf32>
    %133 = math.exp %132 : vector<16x16xf32>
    %cst_42 = arith.constant dense<0.000000e+00> : vector<16xf32>
    %134 = vector.multi_reduction <add>, %133, %cst_42 [1] : vector<16x16xf32> to vector<16xf32>
    %135 = vector.shape_cast %134 : vector<16xf32> to vector<16x1xf32>
    %136 = tpu.reciprocal %135 {approx = true} : vector<16x1xf32> -> vector<16x1xf32>
    %137 = vector.broadcast %136 : vector<16x1xf32> to vector<16x16xf32>
    %138 = arith.mulf %133, %137 : vector<16x16xf32>
    %139 = arith.truncf %138 : vector<16x16xf32> to vector<16x16xbf16>
    %140 = vector.extract_strided_slice %90 {offsets = [0, 16], sizes = [16, 8], strides = [1, 1]} : vector<16x32xbf16> to vector<16x8xbf16>
    %cst_43 = arith.constant dense<0.000000e+00> : vector<16x8xf32>
    %141 = tpu.matmul %139, %140, %cst_43 {dimension_numbers = #tpu.dot_dimension_numbers<[1], [0], [0], [1], [0, 0, 1, 1], [], []>} : vector<16x16xbf16>, vector<16x8xbf16>, vector<16x8xf32> -> vector<16x8xf32>
    %142 = vector.extract_strided_slice %80 {offsets = [0, 24], sizes = [16, 8], strides = [1, 1]} : vector<16x32xbf16> to vector<16x8xbf16>
    %143 = vector.extract_strided_slice %85 {offsets = [0, 24], sizes = [16, 8], strides = [1, 1]} : vector<16x32xbf16> to vector<16x8xbf16>
    "tpu.trace_start"() <{level = 10 : i32, message = "qd,kd->qk"}> : () -> ()
    %cst_44 = arith.constant dense<0.000000e+00> : vector<16x16xf32>
    %144 = tpu.matmul %142, %143, %cst_44 {dimension_numbers = #tpu.dot_dimension_numbers<[1], [1], [0], [0], [0, 0, 1, 0], [], []>} : vector<16x8xbf16>, vector<16x8xbf16>, vector<16x16xf32> -> vector<16x16xf32>
    "tpu.trace_stop"() : () -> ()
    %145 = arith.addf %144, %19 : vector<16x16xf32>
    %cst_45 = arith.constant dense<0xFF800000> : vector<16xf32>
    %146 = vector.multi_reduction <maximumf>, %145, %cst_45 [1] : vector<16x16xf32> to vector<16xf32>
    %147 = vector.shape_cast %146 : vector<16xf32> to vector<16x1xf32>
    %148 = vector.broadcast %147 : vector<16x1xf32> to vector<16x16xf32>
    %149 = arith.subf %145, %148 : vector<16x16xf32>
    %150 = math.exp %149 : vector<16x16xf32>
    %cst_46 = arith.constant dense<0.000000e+00> : vector<16xf32>
    %151 = vector.multi_reduction <add>, %150, %cst_46 [1] : vector<16x16xf32> to vector<16xf32>
    %152 = vector.shape_cast %151 : vector<16xf32> to vector<16x1xf32>
    %153 = tpu.reciprocal %152 {approx = true} : vector<16x1xf32> -> vector<16x1xf32>
    %154 = vector.broadcast %153 : vector<16x1xf32> to vector<16x16xf32>
    %155 = arith.mulf %150, %154 : vector<16x16xf32>
    %156 = arith.truncf %155 : vector<16x16xf32> to vector<16x16xbf16>
    %157 = vector.extract_strided_slice %90 {offsets = [0, 24], sizes = [16, 8], strides = [1, 1]} : vector<16x32xbf16> to vector<16x8xbf16>
    %cst_47 = arith.constant dense<0.000000e+00> : vector<16x8xf32>
    %158 = tpu.matmul %156, %157, %cst_47 {dimension_numbers = #tpu.dot_dimension_numbers<[1], [0], [0], [1], [0, 0, 1, 1], [], []>} : vector<16x16xbf16>, vector<16x8xbf16>, vector<16x8xf32> -> vector<16x8xf32>
    %159 = tpu.concatenate %107, %124, %141, %158 in 1 : vector<16x8xf32>, vector<16x8xf32>, vector<16x8xf32>, vector<16x8xf32> -> vector<16x32xf32>
    %160 = arith.truncf %159 : vector<16x32xf32> to vector<16x32xbf16>
    %c16_48 = arith.constant 16 : index
    %c0_49 = arith.constant 0 : index
    %161 = vector.load %arg5[%c16_48, %c0_49] : memref<368x32xbf16, #tpu.memory_space<vmem>>, vector<32x32xbf16>
    %cst_50 = arith.constant dense<0.000000e+00> : vector<16x32xf32>
    %162 = tpu.matmul %160, %161, %cst_50 {dimension_numbers = #tpu.dot_dimension_numbers<[1], [0], [0], [1], [0, 0, 1, 1], [], []>} : vector<16x32xbf16>, vector<32x32xbf16>, vector<16x32xf32> -> vector<16x32xf32>
    %163 = arith.addf %26, %162 : vector<16x32xf32>
    %164 = vector.shape_cast %38 : vector<32xf32> to vector<1x32xf32>
    %165 = vector.broadcast %164 : vector<1x32xf32> to vector<16x32xf32>
    %166 = arith.addf %163, %165 : vector<16x32xf32>
    %cst_51 = arith.constant dense<0.000000e+00> : vector<16xf32>
    %167 = vector.multi_reduction <add>, %166, %cst_51 [1] : vector<16x32xf32> to vector<16xf32>
    %168 = vector.shape_cast %167 : vector<16xf32> to vector<16x1xf32>
    %cst_52 = arith.constant 3.200000e+01 : f32
    %169 = vector.broadcast %cst_52 : f32 to vector<16x1xf32>
    %170 = arith.divf %168, %169 : vector<16x1xf32>
    %171 = arith.mulf %166, %166 : vector<16x32xf32>
    %cst_53 = arith.constant dense<0.000000e+00> : vector<16xf32>
    %172 = vector.multi_reduction <add>, %171, %cst_53 [1] : vector<16x32xf32> to vector<16xf32>
    %173 = vector.shape_cast %172 : vector<16xf32> to vector<16x1xf32>
    %cst_54 = arith.constant 3.200000e+01 : f32
    %174 = vector.broadcast %cst_54 : f32 to vector<16x1xf32>
    %175 = arith.divf %173, %174 : vector<16x1xf32>
    %176 = arith.mulf %170, %170 : vector<16x1xf32>
    %177 = arith.subf %175, %176 : vector<16x1xf32>
    %178 = vector.broadcast %170 : vector<16x1xf32> to vector<16x32xf32>
    %179 = arith.subf %166, %178 : vector<16x32xf32>
    %cst_55 = arith.constant 9.99999974E-6 : f32
    %180 = vector.broadcast %cst_55 : f32 to vector<16x1xf32>
    %181 = arith.addf %177, %180 : vector<16x1xf32>
    %182 = math.rsqrt %181 : vector<16x1xf32>
    %183 = vector.broadcast %182 : vector<16x1xf32> to vector<16x32xf32>
    %184 = arith.mulf %179, %183 : vector<16x32xf32>
    %185 = vector.shape_cast %40 : vector<32xf32> to vector<1x32xf32>
    %186 = vector.broadcast %185 : vector<1x32xf32> to vector<16x32xf32>
    %187 = arith.mulf %184, %186 : vector<16x32xf32>
    %188 = vector.shape_cast %42 : vector<32xf32> to vector<1x32xf32>
    %189 = vector.broadcast %188 : vector<1x32xf32> to vector<16x32xf32>
    %190 = arith.addf %187, %189 : vector<16x32xf32>
    %191 = arith.truncf %190 : vector<16x32xf32> to vector<16x32xbf16>
    %c0_56 = arith.constant 0 : index
    %c0_57 = arith.constant 0 : index
    %192 = vector.load %arg6[%c0_56, %c0_57] : memref<64x128xbf16, #tpu.memory_space<vmem>>, vector<32x128xbf16>
    %cst_58 = arith.constant dense<0.000000e+00> : vector<16x128xf32>
    %193 = tpu.matmul %191, %192, %cst_58 {dimension_numbers = #tpu.dot_dimension_numbers<[1], [0], [0], [1], [0, 0, 1, 1], [], []>} : vector<16x32xbf16>, vector<32x128xbf16>, vector<16x128xf32> -> vector<16x128xf32>
    %194 = vector.shape_cast %46 : vector<128xf32> to vector<1x128xf32>
    %195 = vector.broadcast %194 : vector<1x128xf32> to vector<16x128xf32>
    %196 = arith.addf %193, %195 : vector<16x128xf32>
    %cst_59 = arith.constant 5.000000e-01 : f32
    %197 = vector.broadcast %cst_59 : f32 to vector<16x128xf32>
    %198 = arith.mulf %197, %196 : vector<16x128xf32>
    %cst_60 = arith.constant 4.471500e-02 : f32
    %199 = vector.broadcast %cst_60 : f32 to vector<16x128xf32>
    %200 = arith.mulf %199, %196 : vector<16x128xf32>
    %201 = arith.mulf %200, %196 : vector<16x128xf32>
    %202 = arith.mulf %201, %196 : vector<16x128xf32>
    %203 = arith.addf %196, %202 : vector<16x128xf32>
    %cst_61 = arith.constant 0.797884583 : f32
    %204 = vector.broadcast %cst_61 : f32 to vector<16x128xf32>
    %205 = arith.mulf %204, %203 : vector<16x128xf32>
    %206 = math.tanh %205 : vector<16x128xf32>
    %cst_62 = arith.constant 1.000000e+00 : f32
    %207 = vector.broadcast %cst_62 : f32 to vector<16x128xf32>
    %208 = arith.addf %207, %206 : vector<16x128xf32>
    %209 = arith.mulf %198, %208 : vector<16x128xf32>
    %210 = arith.truncf %209 : vector<16x128xf32> to vector<16x128xbf16>
    %c80 = arith.constant 80 : index
    %c0_63 = arith.constant 0 : index
    %211 = vector.load %arg5[%c80, %c0_63] : memref<368x32xbf16, #tpu.memory_space<vmem>>, vector<128x32xbf16>
    %cst_64 = arith.constant dense<0.000000e+00> : vector<16x32xf32>
    %212 = tpu.matmul %210, %211, %cst_64 {dimension_numbers = #tpu.dot_dimension_numbers<[1], [0], [0], [1], [0, 0, 1, 1], [], []>} : vector<16x128xbf16>, vector<128x32xbf16>, vector<16x32xf32> -> vector<16x32xf32>
    %213 = arith.addf %166, %212 : vector<16x32xf32>
    %214 = vector.shape_cast %44 : vector<32xf32> to vector<1x32xf32>
    %215 = vector.broadcast %214 : vector<1x32xf32> to vector<16x32xf32>
    %216 = arith.addf %213, %215 : vector<16x32xf32>
    %c16_65 = arith.constant 16 : index
    %c0_66 = arith.constant 0 : index
    %217 = vector.load %arg2[%c16_65, %c0_66] : memref<25x32xf32, #tpu.memory_space<vmem>>, vector<1x32xf32>
    %218 = vector.shape_cast %217 : vector<1x32xf32> to vector<32xf32>
    %c17 = arith.constant 17 : index
    %c0_67 = arith.constant 0 : index
    %219 = vector.load %arg2[%c17, %c0_67] : memref<25x32xf32, #tpu.memory_space<vmem>>, vector<1x32xf32>
    %220 = vector.shape_cast %219 : vector<1x32xf32> to vector<32xf32>
    %c18 = arith.constant 18 : index
    %c0_68 = arith.constant 0 : index
    %221 = vector.load %arg2[%c18, %c0_68] : memref<25x32xf32, #tpu.memory_space<vmem>>, vector<1x32xf32>
    %222 = vector.shape_cast %221 : vector<1x32xf32> to vector<32xf32>
    %c19 = arith.constant 19 : index
    %c0_69 = arith.constant 0 : index
    %223 = vector.load %arg2[%c19, %c0_69] : memref<25x32xf32, #tpu.memory_space<vmem>>, vector<1x32xf32>
    %224 = vector.shape_cast %223 : vector<1x32xf32> to vector<32xf32>
    %c20 = arith.constant 20 : index
    %c0_70 = arith.constant 0 : index
    %225 = vector.load %arg2[%c20, %c0_70] : memref<25x32xf32, #tpu.memory_space<vmem>>, vector<1x32xf32>
    %226 = vector.shape_cast %225 : vector<1x32xf32> to vector<32xf32>
    %c21 = arith.constant 21 : index
    %c0_71 = arith.constant 0 : index
    %227 = vector.load %arg2[%c21, %c0_71] : memref<25x32xf32, #tpu.memory_space<vmem>>, vector<1x32xf32>
    %228 = vector.shape_cast %227 : vector<1x32xf32> to vector<32xf32>
    %c22 = arith.constant 22 : index
    %c0_72 = arith.constant 0 : index
    %229 = vector.load %arg2[%c22, %c0_72] : memref<25x32xf32, #tpu.memory_space<vmem>>, vector<1x32xf32>
    %230 = vector.shape_cast %229 : vector<1x32xf32> to vector<32xf32>
    %c23 = arith.constant 23 : index
    %c0_73 = arith.constant 0 : index
    %231 = vector.load %arg2[%c23, %c0_73] : memref<25x32xf32, #tpu.memory_space<vmem>>, vector<1x32xf32>
    %232 = vector.shape_cast %231 : vector<1x32xf32> to vector<32xf32>
    %c24 = arith.constant 24 : index
    %c0_74 = arith.constant 0 : index
    %233 = vector.load %arg2[%c24, %c0_74] : memref<25x32xf32, #tpu.memory_space<vmem>>, vector<1x32xf32>
    %234 = vector.shape_cast %233 : vector<1x32xf32> to vector<32xf32>
    %c17_75 = arith.constant 17 : index
    %c0_76 = arith.constant 0 : index
    %235 = vector.load %arg3[%c17_75, %c0_76] : memref<18x128xf32, #tpu.memory_space<vmem>>, vector<1x128xf32>
    %236 = vector.shape_cast %235 : vector<1x128xf32> to vector<128xf32>
    %cst_77 = arith.constant dense<0.000000e+00> : vector<16xf32>
    %237 = vector.multi_reduction <add>, %216, %cst_77 [1] : vector<16x32xf32> to vector<16xf32>
    %238 = vector.shape_cast %237 : vector<16xf32> to vector<16x1xf32>
    %cst_78 = arith.constant 3.200000e+01 : f32
    %239 = vector.broadcast %cst_78 : f32 to vector<16x1xf32>
    %240 = arith.divf %238, %239 : vector<16x1xf32>
    %241 = arith.mulf %216, %216 : vector<16x32xf32>
    %cst_79 = arith.constant dense<0.000000e+00> : vector<16xf32>
    %242 = vector.multi_reduction <add>, %241, %cst_79 [1] : vector<16x32xf32> to vector<16xf32>
    %243 = vector.shape_cast %242 : vector<16xf32> to vector<16x1xf32>
    %cst_80 = arith.constant 3.200000e+01 : f32
    %244 = vector.broadcast %cst_80 : f32 to vector<16x1xf32>
    %245 = arith.divf %243, %244 : vector<16x1xf32>
    %246 = arith.mulf %240, %240 : vector<16x1xf32>
    %247 = arith.subf %245, %246 : vector<16x1xf32>
    %248 = vector.broadcast %240 : vector<16x1xf32> to vector<16x32xf32>
    %249 = arith.subf %216, %248 : vector<16x32xf32>
    %cst_81 = arith.constant 9.99999974E-6 : f32
    %250 = vector.broadcast %cst_81 : f32 to vector<16x1xf32>
    %251 = arith.addf %247, %250 : vector<16x1xf32>
    %252 = math.rsqrt %251 : vector<16x1xf32>
    %253 = vector.broadcast %252 : vector<16x1xf32> to vector<16x32xf32>
    %254 = arith.mulf %249, %253 : vector<16x32xf32>
    %255 = vector.shape_cast %218 : vector<32xf32> to vector<1x32xf32>
    %256 = vector.broadcast %255 : vector<1x32xf32> to vector<16x32xf32>
    %257 = arith.mulf %254, %256 : vector<16x32xf32>
    %258 = vector.shape_cast %220 : vector<32xf32> to vector<1x32xf32>
    %259 = vector.broadcast %258 : vector<1x32xf32> to vector<16x32xf32>
    %260 = arith.addf %257, %259 : vector<16x32xf32>
    %261 = arith.truncf %260 : vector<16x32xf32> to vector<16x32xbf16>
    %c32 = arith.constant 32 : index
    %c0_82 = arith.constant 0 : index
    %262 = vector.load %arg4[%c32, %c0_82] : memref<64x96xbf16, #tpu.memory_space<vmem>>, vector<32x96xbf16>
    %cst_83 = arith.constant dense<0.000000e+00> : vector<16x96xf32>
    %263 = tpu.matmul %261, %262, %cst_83 {dimension_numbers = #tpu.dot_dimension_numbers<[1], [0], [0], [1], [0, 0, 1, 1], [], []>} : vector<16x32xbf16>, vector<32x96xbf16>, vector<16x96xf32> -> vector<16x96xf32>
    %264 = vector.extract_strided_slice %263 {offsets = [0, 0], sizes = [16, 32], strides = [1, 1]} : vector<16x96xf32> to vector<16x32xf32>
    %265 = vector.shape_cast %222 : vector<32xf32> to vector<1x32xf32>
    %266 = vector.broadcast %265 : vector<1x32xf32> to vector<16x32xf32>
    %267 = arith.addf %264, %266 : vector<16x32xf32>
    %cst_84 = arith.constant 0.353553385 : f32
    %268 = vector.broadcast %cst_84 : f32 to vector<16x32xf32>
    %269 = arith.mulf %267, %268 : vector<16x32xf32>
    %270 = arith.truncf %269 : vector<16x32xf32> to vector<16x32xbf16>
    %271 = vector.extract_strided_slice %263 {offsets = [0, 32], sizes = [16, 32], strides = [1, 1]} : vector<16x96xf32> to vector<16x32xf32>
    %272 = vector.shape_cast %224 : vector<32xf32> to vector<1x32xf32>
    %273 = vector.broadcast %272 : vector<1x32xf32> to vector<16x32xf32>
    %274 = arith.addf %271, %273 : vector<16x32xf32>
    %275 = arith.truncf %274 : vector<16x32xf32> to vector<16x32xbf16>
    %276 = vector.extract_strided_slice %263 {offsets = [0, 64], sizes = [16, 32], strides = [1, 1]} : vector<16x96xf32> to vector<16x32xf32>
    %277 = vector.shape_cast %226 : vector<32xf32> to vector<1x32xf32>
    %278 = vector.broadcast %277 : vector<1x32xf32> to vector<16x32xf32>
    %279 = arith.addf %276, %278 : vector<16x32xf32>
    %280 = arith.truncf %279 : vector<16x32xf32> to vector<16x32xbf16>
    %281 = vector.extract_strided_slice %270 {offsets = [0, 0], sizes = [16, 8], strides = [1, 1]} : vector<16x32xbf16> to vector<16x8xbf16>
    %282 = vector.extract_strided_slice %275 {offsets = [0, 0], sizes = [16, 8], strides = [1, 1]} : vector<16x32xbf16> to vector<16x8xbf16>
    "tpu.trace_start"() <{level = 10 : i32, message = "qd,kd->qk"}> : () -> ()
    %cst_85 = arith.constant dense<0.000000e+00> : vector<16x16xf32>
    %283 = tpu.matmul %281, %282, %cst_85 {dimension_numbers = #tpu.dot_dimension_numbers<[1], [1], [0], [0], [0, 0, 1, 0], [], []>} : vector<16x8xbf16>, vector<16x8xbf16>, vector<16x16xf32> -> vector<16x16xf32>
    "tpu.trace_stop"() : () -> ()
    %284 = arith.addf %283, %19 : vector<16x16xf32>
    %cst_86 = arith.constant dense<0xFF800000> : vector<16xf32>
    %285 = vector.multi_reduction <maximumf>, %284, %cst_86 [1] : vector<16x16xf32> to vector<16xf32>
    %286 = vector.shape_cast %285 : vector<16xf32> to vector<16x1xf32>
    %287 = vector.broadcast %286 : vector<16x1xf32> to vector<16x16xf32>
    %288 = arith.subf %284, %287 : vector<16x16xf32>
    %289 = math.exp %288 : vector<16x16xf32>
    %cst_87 = arith.constant dense<0.000000e+00> : vector<16xf32>
    %290 = vector.multi_reduction <add>, %289, %cst_87 [1] : vector<16x16xf32> to vector<16xf32>
    %291 = vector.shape_cast %290 : vector<16xf32> to vector<16x1xf32>
    %292 = tpu.reciprocal %291 {approx = true} : vector<16x1xf32> -> vector<16x1xf32>
    %293 = vector.broadcast %292 : vector<16x1xf32> to vector<16x16xf32>
    %294 = arith.mulf %289, %293 : vector<16x16xf32>
    %295 = arith.truncf %294 : vector<16x16xf32> to vector<16x16xbf16>
    %296 = vector.extract_strided_slice %280 {offsets = [0, 0], sizes = [16, 8], strides = [1, 1]} : vector<16x32xbf16> to vector<16x8xbf16>
    %cst_88 = arith.constant dense<0.000000e+00> : vector<16x8xf32>
    %297 = tpu.matmul %295, %296, %cst_88 {dimension_numbers = #tpu.dot_dimension_numbers<[1], [0], [0], [1], [0, 0, 1, 1], [], []>} : vector<16x16xbf16>, vector<16x8xbf16>, vector<16x8xf32> -> vector<16x8xf32>
    %298 = vector.extract_strided_slice %270 {offsets = [0, 8], sizes = [16, 8], strides = [1, 1]} : vector<16x32xbf16> to vector<16x8xbf16>
    %299 = vector.extract_strided_slice %275 {offsets = [0, 8], sizes = [16, 8], strides = [1, 1]} : vector<16x32xbf16> to vector<16x8xbf16>
    "tpu.trace_start"() <{level = 10 : i32, message = "qd,kd->qk"}> : () -> ()
    %cst_89 = arith.constant dense<0.000000e+00> : vector<16x16xf32>
    %300 = tpu.matmul %298, %299, %cst_89 {dimension_numbers = #tpu.dot_dimension_numbers<[1], [1], [0], [0], [0, 0, 1, 0], [], []>} : vector<16x8xbf16>, vector<16x8xbf16>, vector<16x16xf32> -> vector<16x16xf32>
    "tpu.trace_stop"() : () -> ()
    %301 = arith.addf %300, %19 : vector<16x16xf32>
    %cst_90 = arith.constant dense<0xFF800000> : vector<16xf32>
    %302 = vector.multi_reduction <maximumf>, %301, %cst_90 [1] : vector<16x16xf32> to vector<16xf32>
    %303 = vector.shape_cast %302 : vector<16xf32> to vector<16x1xf32>
    %304 = vector.broadcast %303 : vector<16x1xf32> to vector<16x16xf32>
    %305 = arith.subf %301, %304 : vector<16x16xf32>
    %306 = math.exp %305 : vector<16x16xf32>
    %cst_91 = arith.constant dense<0.000000e+00> : vector<16xf32>
    %307 = vector.multi_reduction <add>, %306, %cst_91 [1] : vector<16x16xf32> to vector<16xf32>
    %308 = vector.shape_cast %307 : vector<16xf32> to vector<16x1xf32>
    %309 = tpu.reciprocal %308 {approx = true} : vector<16x1xf32> -> vector<16x1xf32>
    %310 = vector.broadcast %309 : vector<16x1xf32> to vector<16x16xf32>
    %311 = arith.mulf %306, %310 : vector<16x16xf32>
    %312 = arith.truncf %311 : vector<16x16xf32> to vector<16x16xbf16>
    %313 = vector.extract_strided_slice %280 {offsets = [0, 8], sizes = [16, 8], strides = [1, 1]} : vector<16x32xbf16> to vector<16x8xbf16>
    %cst_92 = arith.constant dense<0.000000e+00> : vector<16x8xf32>
    %314 = tpu.matmul %312, %313, %cst_92 {dimension_numbers = #tpu.dot_dimension_numbers<[1], [0], [0], [1], [0, 0, 1, 1], [], []>} : vector<16x16xbf16>, vector<16x8xbf16>, vector<16x8xf32> -> vector<16x8xf32>
    %315 = vector.extract_strided_slice %270 {offsets = [0, 16], sizes = [16, 8], strides = [1, 1]} : vector<16x32xbf16> to vector<16x8xbf16>
    %316 = vector.extract_strided_slice %275 {offsets = [0, 16], sizes = [16, 8], strides = [1, 1]} : vector<16x32xbf16> to vector<16x8xbf16>
    "tpu.trace_start"() <{level = 10 : i32, message = "qd,kd->qk"}> : () -> ()
    %cst_93 = arith.constant dense<0.000000e+00> : vector<16x16xf32>
    %317 = tpu.matmul %315, %316, %cst_93 {dimension_numbers = #tpu.dot_dimension_numbers<[1], [1], [0], [0], [0, 0, 1, 0], [], []>} : vector<16x8xbf16>, vector<16x8xbf16>, vector<16x16xf32> -> vector<16x16xf32>
    "tpu.trace_stop"() : () -> ()
    %318 = arith.addf %317, %19 : vector<16x16xf32>
    %cst_94 = arith.constant dense<0xFF800000> : vector<16xf32>
    %319 = vector.multi_reduction <maximumf>, %318, %cst_94 [1] : vector<16x16xf32> to vector<16xf32>
    %320 = vector.shape_cast %319 : vector<16xf32> to vector<16x1xf32>
    %321 = vector.broadcast %320 : vector<16x1xf32> to vector<16x16xf32>
    %322 = arith.subf %318, %321 : vector<16x16xf32>
    %323 = math.exp %322 : vector<16x16xf32>
    %cst_95 = arith.constant dense<0.000000e+00> : vector<16xf32>
    %324 = vector.multi_reduction <add>, %323, %cst_95 [1] : vector<16x16xf32> to vector<16xf32>
    %325 = vector.shape_cast %324 : vector<16xf32> to vector<16x1xf32>
    %326 = tpu.reciprocal %325 {approx = true} : vector<16x1xf32> -> vector<16x1xf32>
    %327 = vector.broadcast %326 : vector<16x1xf32> to vector<16x16xf32>
    %328 = arith.mulf %323, %327 : vector<16x16xf32>
    %329 = arith.truncf %328 : vector<16x16xf32> to vector<16x16xbf16>
    %330 = vector.extract_strided_slice %280 {offsets = [0, 16], sizes = [16, 8], strides = [1, 1]} : vector<16x32xbf16> to vector<16x8xbf16>
    %cst_96 = arith.constant dense<0.000000e+00> : vector<16x8xf32>
    %331 = tpu.matmul %329, %330, %cst_96 {dimension_numbers = #tpu.dot_dimension_numbers<[1], [0], [0], [1], [0, 0, 1, 1], [], []>} : vector<16x16xbf16>, vector<16x8xbf16>, vector<16x8xf32> -> vector<16x8xf32>
    %332 = vector.extract_strided_slice %270 {offsets = [0, 24], sizes = [16, 8], strides = [1, 1]} : vector<16x32xbf16> to vector<16x8xbf16>
    %333 = vector.extract_strided_slice %275 {offsets = [0, 24], sizes = [16, 8], strides = [1, 1]} : vector<16x32xbf16> to vector<16x8xbf16>
    "tpu.trace_start"() <{level = 10 : i32, message = "qd,kd->qk"}> : () -> ()
    %cst_97 = arith.constant dense<0.000000e+00> : vector<16x16xf32>
    %334 = tpu.matmul %332, %333, %cst_97 {dimension_numbers = #tpu.dot_dimension_numbers<[1], [1], [0], [0], [0, 0, 1, 0], [], []>} : vector<16x8xbf16>, vector<16x8xbf16>, vector<16x16xf32> -> vector<16x16xf32>
    "tpu.trace_stop"() : () -> ()
    %335 = arith.addf %334, %19 : vector<16x16xf32>
    %cst_98 = arith.constant dense<0xFF800000> : vector<16xf32>
    %336 = vector.multi_reduction <maximumf>, %335, %cst_98 [1] : vector<16x16xf32> to vector<16xf32>
    %337 = vector.shape_cast %336 : vector<16xf32> to vector<16x1xf32>
    %338 = vector.broadcast %337 : vector<16x1xf32> to vector<16x16xf32>
    %339 = arith.subf %335, %338 : vector<16x16xf32>
    %340 = math.exp %339 : vector<16x16xf32>
    %cst_99 = arith.constant dense<0.000000e+00> : vector<16xf32>
    %341 = vector.multi_reduction <add>, %340, %cst_99 [1] : vector<16x16xf32> to vector<16xf32>
    %342 = vector.shape_cast %341 : vector<16xf32> to vector<16x1xf32>
    %343 = tpu.reciprocal %342 {approx = true} : vector<16x1xf32> -> vector<16x1xf32>
    %344 = vector.broadcast %343 : vector<16x1xf32> to vector<16x16xf32>
    %345 = arith.mulf %340, %344 : vector<16x16xf32>
    %346 = arith.truncf %345 : vector<16x16xf32> to vector<16x16xbf16>
    %347 = vector.extract_strided_slice %280 {offsets = [0, 24], sizes = [16, 8], strides = [1, 1]} : vector<16x32xbf16> to vector<16x8xbf16>
    %cst_100 = arith.constant dense<0.000000e+00> : vector<16x8xf32>
    %348 = tpu.matmul %346, %347, %cst_100 {dimension_numbers = #tpu.dot_dimension_numbers<[1], [0], [0], [1], [0, 0, 1, 1], [], []>} : vector<16x16xbf16>, vector<16x8xbf16>, vector<16x8xf32> -> vector<16x8xf32>
    %349 = tpu.concatenate %297, %314, %331, %348 in 1 : vector<16x8xf32>, vector<16x8xf32>, vector<16x8xf32>, vector<16x8xf32> -> vector<16x32xf32>
    %350 = arith.truncf %349 : vector<16x32xf32> to vector<16x32xbf16>
    %c48 = arith.constant 48 : index
    %c0_101 = arith.constant 0 : index
    %351 = vector.load %arg5[%c48, %c0_101] : memref<368x32xbf16, #tpu.memory_space<vmem>>, vector<32x32xbf16>
    %cst_102 = arith.constant dense<0.000000e+00> : vector<16x32xf32>
    %352 = tpu.matmul %350, %351, %cst_102 {dimension_numbers = #tpu.dot_dimension_numbers<[1], [0], [0], [1], [0, 0, 1, 1], [], []>} : vector<16x32xbf16>, vector<32x32xbf16>, vector<16x32xf32> -> vector<16x32xf32>
    %353 = arith.addf %216, %352 : vector<16x32xf32>
    %354 = vector.shape_cast %228 : vector<32xf32> to vector<1x32xf32>
    %355 = vector.broadcast %354 : vector<1x32xf32> to vector<16x32xf32>
    %356 = arith.addf %353, %355 : vector<16x32xf32>
    %cst_103 = arith.constant dense<0.000000e+00> : vector<16xf32>
    %357 = vector.multi_reduction <add>, %356, %cst_103 [1] : vector<16x32xf32> to vector<16xf32>
    %358 = vector.shape_cast %357 : vector<16xf32> to vector<16x1xf32>
    %cst_104 = arith.constant 3.200000e+01 : f32
    %359 = vector.broadcast %cst_104 : f32 to vector<16x1xf32>
    %360 = arith.divf %358, %359 : vector<16x1xf32>
    %361 = arith.mulf %356, %356 : vector<16x32xf32>
    %cst_105 = arith.constant dense<0.000000e+00> : vector<16xf32>
    %362 = vector.multi_reduction <add>, %361, %cst_105 [1] : vector<16x32xf32> to vector<16xf32>
    %363 = vector.shape_cast %362 : vector<16xf32> to vector<16x1xf32>
    %cst_106 = arith.constant 3.200000e+01 : f32
    %364 = vector.broadcast %cst_106 : f32 to vector<16x1xf32>
    %365 = arith.divf %363, %364 : vector<16x1xf32>
    %366 = arith.mulf %360, %360 : vector<16x1xf32>
    %367 = arith.subf %365, %366 : vector<16x1xf32>
    %368 = vector.broadcast %360 : vector<16x1xf32> to vector<16x32xf32>
    %369 = arith.subf %356, %368 : vector<16x32xf32>
    %cst_107 = arith.constant 9.99999974E-6 : f32
    %370 = vector.broadcast %cst_107 : f32 to vector<16x1xf32>
    %371 = arith.addf %367, %370 : vector<16x1xf32>
    %372 = math.rsqrt %371 : vector<16x1xf32>
    %373 = vector.broadcast %372 : vector<16x1xf32> to vector<16x32xf32>
    %374 = arith.mulf %369, %373 : vector<16x32xf32>
    %375 = vector.shape_cast %230 : vector<32xf32> to vector<1x32xf32>
    %376 = vector.broadcast %375 : vector<1x32xf32> to vector<16x32xf32>
    %377 = arith.mulf %374, %376 : vector<16x32xf32>
    %378 = vector.shape_cast %232 : vector<32xf32> to vector<1x32xf32>
    %379 = vector.broadcast %378 : vector<1x32xf32> to vector<16x32xf32>
    %380 = arith.addf %377, %379 : vector<16x32xf32>
    %381 = arith.truncf %380 : vector<16x32xf32> to vector<16x32xbf16>
    %c32_108 = arith.constant 32 : index
    %c0_109 = arith.constant 0 : index
    %382 = vector.load %arg6[%c32_108, %c0_109] : memref<64x128xbf16, #tpu.memory_space<vmem>>, vector<32x128xbf16>
    %cst_110 = arith.constant dense<0.000000e+00> : vector<16x128xf32>
    %383 = tpu.matmul %381, %382, %cst_110 {dimension_numbers = #tpu.dot_dimension_numbers<[1], [0], [0], [1], [0, 0, 1, 1], [], []>} : vector<16x32xbf16>, vector<32x128xbf16>, vector<16x128xf32> -> vector<16x128xf32>
    %384 = vector.shape_cast %236 : vector<128xf32> to vector<1x128xf32>
    %385 = vector.broadcast %384 : vector<1x128xf32> to vector<16x128xf32>
    %386 = arith.addf %383, %385 : vector<16x128xf32>
    %cst_111 = arith.constant 5.000000e-01 : f32
    %387 = vector.broadcast %cst_111 : f32 to vector<16x128xf32>
    %388 = arith.mulf %387, %386 : vector<16x128xf32>
    %cst_112 = arith.constant 4.471500e-02 : f32
    %389 = vector.broadcast %cst_112 : f32 to vector<16x128xf32>
    %390 = arith.mulf %389, %386 : vector<16x128xf32>
    %391 = arith.mulf %390, %386 : vector<16x128xf32>
    %392 = arith.mulf %391, %386 : vector<16x128xf32>
    %393 = arith.addf %386, %392 : vector<16x128xf32>
    %cst_113 = arith.constant 0.797884583 : f32
    %394 = vector.broadcast %cst_113 : f32 to vector<16x128xf32>
    %395 = arith.mulf %394, %393 : vector<16x128xf32>
    %396 = math.tanh %395 : vector<16x128xf32>
    %cst_114 = arith.constant 1.000000e+00 : f32
    %397 = vector.broadcast %cst_114 : f32 to vector<16x128xf32>
    %398 = arith.addf %397, %396 : vector<16x128xf32>
    %399 = arith.mulf %388, %398 : vector<16x128xf32>
    %400 = arith.truncf %399 : vector<16x128xf32> to vector<16x128xbf16>
    %c208 = arith.constant 208 : index
    %c0_115 = arith.constant 0 : index
    %401 = vector.load %arg5[%c208, %c0_115] : memref<368x32xbf16, #tpu.memory_space<vmem>>, vector<128x32xbf16>
    %cst_116 = arith.constant dense<0.000000e+00> : vector<16x32xf32>
    %402 = tpu.matmul %400, %401, %cst_116 {dimension_numbers = #tpu.dot_dimension_numbers<[1], [0], [0], [1], [0, 0, 1, 1], [], []>} : vector<16x128xbf16>, vector<128x32xbf16>, vector<16x32xf32> -> vector<16x32xf32>
    %403 = arith.addf %356, %402 : vector<16x32xf32>
    %404 = vector.shape_cast %234 : vector<32xf32> to vector<1x32xf32>
    %405 = vector.broadcast %404 : vector<1x32xf32> to vector<16x32xf32>
    %406 = arith.addf %403, %405 : vector<16x32xf32>
    %cst_117 = arith.constant dense<0.000000e+00> : vector<16xf32>
    %407 = vector.multi_reduction <add>, %406, %cst_117 [1] : vector<16x32xf32> to vector<16xf32>
    %408 = vector.shape_cast %407 : vector<16xf32> to vector<16x1xf32>
    %cst_118 = arith.constant 3.200000e+01 : f32
    %409 = vector.broadcast %cst_118 : f32 to vector<16x1xf32>
    %410 = arith.divf %408, %409 : vector<16x1xf32>
    %411 = arith.mulf %406, %406 : vector<16x32xf32>
    %cst_119 = arith.constant dense<0.000000e+00> : vector<16xf32>
    %412 = vector.multi_reduction <add>, %411, %cst_119 [1] : vector<16x32xf32> to vector<16xf32>
    %413 = vector.shape_cast %412 : vector<16xf32> to vector<16x1xf32>
    %cst_120 = arith.constant 3.200000e+01 : f32
    %414 = vector.broadcast %cst_120 : f32 to vector<16x1xf32>
    %415 = arith.divf %413, %414 : vector<16x1xf32>
    %416 = arith.mulf %410, %410 : vector<16x1xf32>
    %417 = arith.subf %415, %416 : vector<16x1xf32>
    %418 = vector.broadcast %410 : vector<16x1xf32> to vector<16x32xf32>
    %419 = arith.subf %406, %418 : vector<16x32xf32>
    %cst_121 = arith.constant 9.99999974E-6 : f32
    %420 = vector.broadcast %cst_121 : f32 to vector<16x1xf32>
    %421 = arith.addf %417, %420 : vector<16x1xf32>
    %422 = math.rsqrt %421 : vector<16x1xf32>
    %423 = vector.broadcast %422 : vector<16x1xf32> to vector<16x32xf32>
    %424 = arith.mulf %419, %423 : vector<16x32xf32>
    %425 = vector.shape_cast %3 : vector<32xf32> to vector<1x32xf32>
    %426 = vector.broadcast %425 : vector<1x32xf32> to vector<16x32xf32>
    %427 = arith.mulf %424, %426 : vector<16x32xf32>
    %428 = vector.shape_cast %5 : vector<32xf32> to vector<1x32xf32>
    %429 = vector.broadcast %428 : vector<1x32xf32> to vector<16x32xf32>
    %430 = arith.addf %427, %429 : vector<16x32xf32>
    %431 = arith.truncf %430 : vector<16x32xf32> to vector<16x32xbf16>
    %c336 = arith.constant 336 : index
    %c0_122 = arith.constant 0 : index
    %432 = vector.load %arg5[%c336, %c0_122] : memref<368x32xbf16, #tpu.memory_space<vmem>>, vector<32x32xbf16>
    %cst_123 = arith.constant dense<0.000000e+00> : vector<16x32xf32>
    %433 = tpu.matmul %431, %432, %cst_123 {dimension_numbers = #tpu.dot_dimension_numbers<[1], [0], [0], [1], [0, 0, 1, 1], [], []>} : vector<16x32xbf16>, vector<32x32xbf16>, vector<16x32xf32> -> vector<16x32xf32>
    %434 = vector.extract_strided_slice %433 {offsets = [0, 0], sizes = [16, 4], strides = [1, 1]} : vector<16x32xf32> to vector<16x4xf32>
    %435 = vector.extract_strided_slice %434 {offsets = [0, 0], sizes = [8, 4], strides = [1, 1]} : vector<16x4xf32> to vector<8x4xf32>
    %cst_124 = arith.constant dense<0.000000e+00> : vector<4xf32>
    %436 = vector.multi_reduction <add>, %435, %cst_124 [0] : vector<8x4xf32> to vector<4xf32>
    %437 = vector.shape_cast %436 : vector<4xf32> to vector<1x4xf32>
    %cst_125 = arith.constant 8.000000e+00 : f32
    %438 = vector.broadcast %cst_125 : f32 to vector<1x4xf32>
    %439 = arith.divf %437, %438 : vector<1x4xf32>
    %440 = vector.shape_cast %439 : vector<1x4xf32> to vector<1x4xf32>
    %441 = vector.broadcast %440 : vector<1x4xf32> to vector<8x4xf32>
    %442 = vector.extract_strided_slice %434 {offsets = [8, 0], sizes = [8, 4], strides = [1, 1]} : vector<16x4xf32> to vector<8x4xf32>
    %cst_126 = arith.constant dense<0.000000e+00> : vector<4xf32>
    %443 = vector.multi_reduction <add>, %442, %cst_126 [0] : vector<8x4xf32> to vector<4xf32>
    %444 = vector.shape_cast %443 : vector<4xf32> to vector<1x4xf32>
    %cst_127 = arith.constant 8.000000e+00 : f32
    %445 = vector.broadcast %cst_127 : f32 to vector<1x4xf32>
    %446 = arith.divf %444, %445 : vector<1x4xf32>
    %447 = vector.shape_cast %446 : vector<1x4xf32> to vector<1x4xf32>
    %448 = vector.broadcast %447 : vector<1x4xf32> to vector<8x4xf32>
    %449 = tpu.concatenate %441, %448 in 0 : vector<8x4xf32>, vector<8x4xf32> -> vector<16x4xf32>
    %450 = vector.shape_cast %8 : vector<4xf32> to vector<1x4xf32>
    %451 = vector.broadcast %450 : vector<1x4xf32> to vector<16x4xf32>
    %452 = arith.mulf %434, %451 : vector<16x4xf32>
    %453 = vector.shape_cast %11 : vector<4xf32> to vector<1x4xf32>
    %454 = vector.broadcast %453 : vector<1x4xf32> to vector<16x4xf32>
    %455 = arith.mulf %449, %454 : vector<16x4xf32>
    %456 = arith.addf %452, %455 : vector<16x4xf32>
    %cst_128 = arith.constant 0.000000e+00 : f32
    %457 = vector.broadcast %cst_128 : f32 to vector<4xf32>
    %458 = vector.extract_strided_slice %456 {offsets = [1, 0], sizes = [7, 4], strides = [1, 1]} : vector<16x4xf32> to vector<7x4xf32>
    %459 = vector.extract_strided_slice %456 {offsets = [0, 0], sizes = [7, 4], strides = [1, 1]} : vector<16x4xf32> to vector<7x4xf32>
    %460 = arith.subf %458, %459 : vector<7x4xf32>
    %461 = math.absf %460 : vector<7x4xf32>
    %cst_129 = arith.constant dense<0.000000e+00> : vector<4xf32>
    %462 = vector.multi_reduction <add>, %461, %cst_129 [0] : vector<7x4xf32> to vector<4xf32>
    %463 = arith.addf %457, %462 : vector<4xf32>
    %464 = vector.extract_strided_slice %456 {offsets = [9, 0], sizes = [7, 4], strides = [1, 1]} : vector<16x4xf32> to vector<7x4xf32>
    %465 = vector.extract_strided_slice %456 {offsets = [8, 0], sizes = [7, 4], strides = [1, 1]} : vector<16x4xf32> to vector<7x4xf32>
    %466 = arith.subf %464, %465 : vector<7x4xf32>
    %467 = math.absf %466 : vector<7x4xf32>
    %cst_130 = arith.constant dense<0.000000e+00> : vector<4xf32>
    %468 = vector.multi_reduction <add>, %467, %cst_130 [0] : vector<7x4xf32> to vector<4xf32>
    %469 = arith.addf %463, %468 : vector<4xf32>
    %cst_131 = arith.constant 1.400000e+01 : f32
    %470 = vector.broadcast %cst_131 : f32 to vector<4xf32>
    %471 = arith.divf %469, %470 : vector<4xf32>
    %472 = vector.shape_cast %471 : vector<4xf32> to vector<1x4xf32>
    %c0_132 = arith.constant 0 : index
    %c0_133 = arith.constant 0 : index
    %473 = vector.load %arg8[%c0_132, %c0_133] : memref<1x4xf32, #tpu.memory_space<vmem>>, vector<1x4xf32>
    tpu.vector_store %arg8[%c0_132, %c0_133], %472 {strides = array<i32>} : memref<1x4xf32, #tpu.memory_space<vmem>>, vector<1x4xf32>,
    %cst_134 = arith.constant -1.000000e+00 : f32
    %474 = vector.broadcast %cst_134 : f32 to vector<16x4xf32>
    %475 = arith.mulf %474, %456 : vector<16x4xf32>
    %476 = math.exp %475 : vector<16x4xf32>
    %cst_135 = arith.constant 1.000000e+00 : f32
    %477 = vector.broadcast %cst_135 : f32 to vector<16x4xf32>
    %478 = arith.addf %477, %476 : vector<16x4xf32>
    %479 = tpu.reciprocal %478 {approx = true} : vector<16x4xf32> -> vector<16x4xf32>
    %480 = vector.shape_cast %17 : vector<4xf32> to vector<1x4xf32>
    %481 = vector.broadcast %480 : vector<1x4xf32> to vector<16x4xf32>
    %482 = arith.mulf %481, %479 : vector<16x4xf32>
    %483 = vector.shape_cast %14 : vector<4xf32> to vector<1x4xf32>
    %484 = vector.broadcast %483 : vector<1x4xf32> to vector<16x4xf32>
    %485 = arith.addf %484, %482 : vector<16x4xf32>
    %c0_136 = arith.constant 0 : index
    %c0_137 = arith.constant 0 : index
    %486 = vector.load %arg7[%c0_136, %c0_137] : memref<16x4xf32, #tpu.memory_space<vmem>>, vector<16x4xf32>
    tpu.vector_store %arg7[%c0_136, %c0_137], %485 {strides = array<i32>} : memref<16x4xf32, #tpu.memory_space<vmem>>, vector<16x4xf32>,
    return
  }
  func.func @transform_0(%arg0: i32) -> (i32, i32) {
    %c0_i32 = arith.constant 0 : i32
    %c0_i32_0 = arith.constant 0 : i32
    %c0_i32_1 = arith.constant 0 : i32
    return %c0_i32, %c0_i32_0 : i32, i32
  }
  func.func @transform_1(%arg0: i32) -> (i32, i32) {
    %c0_i32 = arith.constant 0 : i32
    %c0_i32_0 = arith.constant 0 : i32
    %c0_i32_1 = arith.constant 0 : i32
    return %c0_i32, %c0_i32_0 : i32, i32
  }
  func.func @transform_2(%arg0: i32) -> (i32, i32) {
    %c0_i32 = arith.constant 0 : i32
    %c0_i32_0 = arith.constant 0 : i32
    %c0_i32_1 = arith.constant 0 : i32
    return %c0_i32, %c0_i32_0 : i32, i32
  }
  func.func @transform_3(%arg0: i32) -> (i32, i32) {
    %c0_i32 = arith.constant 0 : i32
    %c0_i32_0 = arith.constant 0 : i32
    %c0_i32_1 = arith.constant 0 : i32
    return %c0_i32, %c0_i32_0 : i32, i32
  }
  func.func @transform_4(%arg0: i32) -> (i32, i32) {
    %c0_i32 = arith.constant 0 : i32
    %c0_i32_0 = arith.constant 0 : i32
    %c0_i32_1 = arith.constant 0 : i32
    return %c0_i32, %c0_i32_0 : i32, i32
  }
  func.func @transform_5(%arg0: i32) -> (i32, i32) {
    %c0_i32 = arith.constant 0 : i32
    %c0_i32_0 = arith.constant 0 : i32
    %c0_i32_1 = arith.constant 0 : i32
    return %c0_i32, %c0_i32_0 : i32, i32
  }
  func.func @transform_6(%arg0: i32) -> (i32, i32) {
    %c0_i32 = arith.constant 0 : i32
    %c0_i32_0 = arith.constant 0 : i32
    %c0_i32_1 = arith.constant 0 : i32
    return %c0_i32, %c0_i32_0 : i32, i32
  }
  func.func @transform_7(%arg0: i32) -> (i32, i32) {
    %c0_i32 = arith.constant 0 : i32
    %c0_i32_0 = arith.constant 0 : i32
    %c0_i32_1 = arith.constant 0 : i32
    return %c0_i32, %c0_i32_0 : i32, i32
  }
}

</mosaic_0001>

<bundles_post_ra>
// kernel: forward.1
= control target key start
LH: loop header
LB: loop body
LE: loop exit
PB: predicated region body
PF: predicated region fallthrough
CT: control target
= control target key end

     0   :  { %vm48_vm0 = vcmask 130048   ;;  %s2524_s0 = inlined_call_operand.vmem [shape: f32[16,16], index: 0, kind: input, shape index: {}]   ;;  %s2525_s1 = inlined_call_operand.vmem [shape: f32[25,32], index: 1, kind: input, shape index: {}]   ;;  %s2526_s2 = inlined_call_operand.vmem [shape: f32[18,128], index: 2, kind: input, shape index: {}]   ;;  %s2527_s3 = inlined_call_operand.vmem [shape: bf16[64,96], index: 3, kind: input, shape index: {}]   ;;  %s2528_s4 = inlined_call_operand.vmem [shape: bf16[368,32], index: 4, kind: input, shape index: {}]   ;;  %s2529_s5 = inlined_call_operand.vmem [shape: bf16[64,128], index: 5, kind: input, shape index: {}]   ;;  %s2530_s6 = inlined_call_operand.vmem [shape: f32[16,4], index: 6, kind: output, shape index: {0}]   ;;  %s2531_s7 = inlined_call_operand.hbm [shape: f32[1,4], index: 7, kind: output, shape index: {1}]  }
   0x1   :  { %v1753_v0 = vld [vmem:[%s2528_s4] sm:$0xff]  ;;  %v37_v2 = vld [vmem:[%s2524_s0 + $0x8] sm:$0xff] }
   0x2   :  { %v36_v1 = vld [vmem:[%s2524_s0] sm:$0xff]  ;;  %59 = vmatpush.bf16.msra.mxu0 %v1753_v0 }
   0x3   :  { %v38_v3 = vpack.c.bf16 %v37_v2, %v36_v1 }
   0x5   :  { %1609 = vmatmul.msk.bf16.vlgmr.msra.gmra.mxu0 %vm48_vm0, %v38_v3 }
   0x6   :  { %13 = vsyncpa [#allocation3], 0  ;;  %v1833_v4 = vld [vmem:[%s2525_s1] ss:$0 sm:$0xff]  ;;  %vm76_vm1 = vcmask 261120   ;;  %v1992_v15 = vmov 32.0  }
   0x7   :  { %1860 = vrcp.f32 %v1992_v15  ;;  %v1755_v25 = vld [vmem:[%s2527_s3 + $0x8] sm:$0xff]  ;;  %v1754_v28 = vld [vmem:[%s2527_s3] sm:$0xff]  ;;  %s1993_s14 = smov 32   ;;  %s1994_s21 = smov 88   ;;  %vm209_vm9 = vcmask 64512   ;;  %vm507_vm10 = vcmask 195584  }
   0x8   :  { %164 = vmatpush.bf16.msra.mxu1 %v1755_v25  ;;  %v1836_v36 = vld [vmem:[%s2525_s1 + $0xa] ss:$0 sm:$0xff]  ;;  %v1834_v53 = vld [vmem:[%s2525_s1 + $0x7] ss:$0 sm:$0xff]  ;;  %v1835_v59 = vld [vmem:[%s2525_s1 + $0x8] ss:$0 sm:$0xff] }
   0x9   :  { %181 = vrot.lane.b32.xlu2 %v1836_v36, %s1993_s14  ;;  %v1837_v0 = vld [vmem:[%s2525_s1 + $0x9] ss:$0 sm:$0xff]  ;;  %s1995_s22 = smov 96   ;;  %s1996_s23 = smov 120  }
   0xa   :  { %s1997_s24 = smov 80   ;;  %s1998_s25 = smov 104  }
   0xb   :  { %s1999_s26 = smov 72   ;;  %s2000_s27 = smov 112  }
   0xc   :  { %165 = vmatpush.bf16.msra.mxu1 %v1754_v28  ;;  %s2001_s10 = smov 64   ;;  %s2002_s11 = smov 56  }
   0xd   :  { %v1861_v16 = vpop.eup %1860  ;;  %s2003_s12 = smov 48   ;;  %s2004_s13 = smov 40  }
   0xe   :  { %v84_v17 = vmul.f32 32.0, %v1861_v16  ;;  %vm88_vm2 = vweird.f32 %v1861_v16  ;;  %s2005_s15 = smov 8   ;;  %s2006_s16 = smov 16  }
   0xf   :  { %s2532_s17 = smov 24  }
  0x10   :  { %v85_v18 = vsub.f32 1.0, %v84_v17 }
  0x12   :  { %v86_v19 = vmul.f32 %v1861_v16, %v85_v18 }
  0x14   :  { %v87_v20 = vadd.f32 %v1861_v16, %v86_v19 }
  0x16   :  { %v2078_v21 = vsel %vm88_vm2, %v1861_v16, %v87_v20 }
  0x63   :  { %v182_v2 = vpop.permute.xlu2 %181 }
  0x82   :  { %v61_v5 = vpop.f32.mrf.mxu0 }
  0x83   :  { %v2064_v6 = vadd.f32 %v1833_v4, %v61_v5 }
  0x85   :  { %v77_v7 = vsel %vm76_vm1, %v2064_v6, 0.0  ;;  %v92_v8 = vmul.f32 %v2064_v6, %v2064_v6 }
  0x86   :  { %78 = vadd.xlane.f32.xlu0 %v77_v7 }
  0x87   :  { %v94_v9 = vsel %vm76_vm1, %v92_v8, 0.0 }
  0x88   :  { %95 = vadd.xlane.f32.xlu1 %v94_v9 }
  0x8a   :  { %v63_v10 = vpop.f32.mrf.mxu0 }
  0x8b   :  { %v2071_v11 = vadd.f32 %v1833_v4, %v63_v10 }
  0x8d   :  { %v80_v12 = vsel %vm76_vm1, %v2071_v11, 0.0  ;;  %v93_v13 = vmul.f32 %v2071_v11, %v2071_v11 }
  0x8e   :  { %81 = vadd.xlane.f32.xlu0 %v80_v12 }
  0x8f   :  { %v97_v14 = vsel %vm76_vm1, %v93_v13, 0.0 }
  0x90   :  { %98 = vadd.xlane.f32.xlu1 %v97_v14 }
  0xf9   :  { %v79_v22 = vpop.xlane.xlu0 %78 }
  0xfa   :  { %v90_v23 = vmul.f32 %v2078_v21, %v79_v22 }
  0xfb   :  { %v96_v24 = vpop.xlane.xlu1 %95 }
  0xfc   :  { %v102_v26 = vmul.f32 %v90_v23, %v90_v23  ;;  %v100_v27 = vmul.f32 %v96_v24, %v2078_v21  ;;  %v106_v50 = vsub.f32 %v2064_v6, %v90_v23 }
  0xfe   :  { %v104_v29 = vsub.f32 %v100_v27, %v102_v26 }
 0x100   :  { %v108_v30 = vadd.f32 1e-05, %v104_v29 }
 0x101   :  { %v82_v31 = vpop.xlane.xlu0 %81 }
 0x102   :  { %1862 = vrsqrt.f32 %v108_v30  ;;  %v91_v32 = vmul.f32 %v2078_v21, %v82_v31  ;;  %vm116_vm4 = vweird.f32 %v108_v30 }
 0x103   :  { %v99_v33 = vpop.xlane.xlu1 %98 }
 0x104   :  { %v103_v34 = vmul.f32 %v91_v32, %v91_v32  ;;  %v101_v35 = vmul.f32 %v99_v33, %v2078_v21  ;;  %v107_v55 = vsub.f32 %v2071_v11, %v91_v32 }
 0x106   :  { %v105_v37 = vsub.f32 %v101_v35, %v103_v34  ;;  %v2132_v34 = vld [vmem:[%s2526_s2] sm:$0xff] }
 0x108   :  { %v1863_v38 = vpop.eup %1862  ;;  %v109_v39 = vadd.f32 1e-05, %v105_v37 }
 0x109   :  { %v111_v40 = vmul.f32 %v1863_v38, %v108_v30  ;;  %vm117_vm3 = vweird.f32 %v1863_v38 }
 0x10a   :  { %1864 = vrsqrt.f32 %v109_v39  ;;  %vm118_vm5 = vmor %vm116_vm4, %vm117_vm3  ;;  %vm126_vm7 = vweird.f32 %v109_v39 }
 0x10b   :  { %v112_v41 = vmul.f32 %v1863_v38, %v111_v40 }
 0x10d   :  { %v113_v42 = vmul.f32 0.5, %v112_v41 }
 0x10f   :  { %v114_v43 = vsub.f32 1.5, %v113_v42 }
 0x110   :  { %v1865_v44 = vpop.eup %1864 }
 0x111   :  { %v115_v45 = vmul.f32 %v1863_v38, %v114_v43  ;;  %v121_v46 = vmul.f32 %v1865_v44, %v109_v39  ;;  %vm127_vm6 = vweird.f32 %v1865_v44 }
 0x112   :  { %vm128_vm8 = vmor %vm126_vm7, %vm127_vm6 }
 0x113   :  { %v122_v47 = vmul.f32 %v1865_v44, %v121_v46  ;;  %v119_v48 = vsel %vm118_vm5, %v1863_v38, %v115_v45  ;;  %v2139_v38 = vld [vmem:[%s2526_s2 + $0x8] sm:$0xff] }
 0x114   :  { %v130_v52 = vmul.f32 %v119_v48, %v106_v50 }
 0x115   :  { %v123_v49 = vmul.f32 0.5, %v122_v47 }
 0x116   :  { %v133_v58 = vmul.f32 %v1834_v53, %v130_v52 }
 0x117   :  { %v124_v51 = vsub.f32 1.5, %v123_v49 }
 0x118   :  { %v136_v61 = vadd.f32 %v1835_v59, %v133_v58 }
 0x119   :  { %v125_v54 = vmul.f32 %v1865_v44, %v124_v51 }
 0x11b   :  { %v129_v56 = vsel %vm128_vm8, %v1865_v44, %v125_v54 }
 0x11c   :  { %v131_v57 = vmul.f32 %v129_v56, %v107_v55 }
 0x11e   :  { %v134_v60 = vmul.f32 %v1834_v53, %v131_v57  ;;  %v1838_v53 = vld [vmem:[%s2525_s1 + $0xb] ss:$0 sm:$0xff] }
 0x120   :  { %v137_v62 = vadd.f32 %v1835_v59, %v134_v60 }
 0x122   :  { %v138_v63 = vpack.c.bf16 %v137_v62, %v136_v61 }
 0x124   :  { %1618 = vmatmul.msk.bf16.vlgmr.msra.gmra.mxu1 %vm76_vm1, %v138_v63 }
 0x1a1   :  { %v2106_v1 = vpop.f32.mrf.mxu1 }
 0x1a2   :  { %v173_v3 = vadd.f32 %v1837_v0, %v2106_v1  ;;  %v184_v4 = vadd.f32 %v182_v2, %v2106_v1 }
 0x1a4   :  { %v175_v5 = vmul.f32 0.35355338, %v173_v3  ;;  %v186_v8 = vpack.c.bf16 %v184_v4, %v184_v4 }
 0x1a6   :  { %v177_v12 = vpack.c.bf16 %v175_v5, %v175_v5  ;;  %v204_v15 = vunpack.c.l.b16 %v186_v8 }
 0x1a8   :  { %v199_v18 = vunpack.c.l.b16 %v177_v12 }
 0x1a9   :  { %v2110_v7 = vpop.f32.mrf.mxu1 }
 0x1aa   :  { %v174_v9 = vadd.f32 %v1837_v0, %v2110_v7  ;;  %v185_v10 = vadd.f32 %v182_v2, %v2110_v7 }
 0x1ac   :  { %v176_v13 = vmul.f32 0.35355338, %v174_v9  ;;  %v187_v14 = vpack.c.bf16 %v185_v10, %v185_v10 }
 0x1ae   :  { %v178_v16 = vpack.c.bf16 %v176_v13, %v176_v13  ;;  %v205_v17 = vunpack.c.l.b16 %v187_v14 }
 0x1b0   :  { %v200_v19 = vunpack.c.l.b16 %v178_v16  ;;  %v206_v20 = vpack.c.b16 %v205_v17, %v204_v15 }
 0x1b2   :  { %v201_v22 = vpack.c.b16 %v200_v19, %v199_v18  ;;  %280 = vrot.lane.b32.xlu0 %v206_v20, %s1994_s21  ;;  %207 = vrot.lane.b32.xlu2 %v206_v20, %s1995_s22 }
 0x1b4   :  { %278 = vrot.lane.b32.xlu1 %v201_v22, %s1996_s23 }
 0x1ba   :  { %347 = vrot.lane.b32.xlu2 %v206_v20, %s1997_s24  ;;  %412 = vrot.lane.b32.xlu0 %v201_v22, %s1998_s25 }
 0x1c2   :  { %414 = vrot.lane.b32.xlu2 %v206_v20, %s1999_s26 }
 0x1ca   :  { %345 = vrot.lane.b32.xlu2 %v201_v22, %s2000_s27 }
 0x20c   :  { %v208_v23 = vpop.permute.xlu2 %207 }
 0x20d   :  { %v214_v24 = vsel %vm209_vm9, %v208_v23, 0 }
 0x20e   :  { %223 = vmatpush.bf16.xpose.msra.mxu2 %v214_v24 }
 0x214   :  { %v348_v25 = vpop.permute.xlu2 %347 }
 0x215   :  { %1619 = vmatmul.msk.bf16.vlgmr.msra.gmra.mxu2 %vm209_vm9, %v201_v22  ;;  %v353_v26 = vsel %vm209_vm9, %v348_v25, 0 }
 0x216   :  { %362 = vmatpush.bf16.xpose.msrb.mxu1 %v353_v26 }
 0x21c   :  { %v415_v27 = vpop.permute.xlu2 %414 }
 0x21d   :  { %v420_v31 = vsel %vm209_vm9, %v415_v27, 0 }
 0x224   :  { %v281_v28 = vpop.permute.xlu0 %280  ;;  %v346_v29 = vpop.permute.xlu2 %345 }
 0x225   :  { %1623 = vmatmul.msk.bf16.vlgmr.msrb.gmra.mxu1 %vm209_vm9, %v346_v29  ;;  %v286_v30 = vsel %vm209_vm9, %v281_v28, 0 }
 0x226   :  { %295 = vmatpush.bf16.xpose.msrb.mxu0 %v286_v30  ;;  %v279_v32 = vpop.permute.xlu1 %278 }
 0x22c   :  { %v413_v33 = vpop.permute.xlu0 %412 }
 0x22d   :  { %1621 = vmatmul.msk.bf16.vlgmr.msrb.gmra.mxu0 %vm209_vm9, %v279_v32 }
 0x22e   :  { %429 = vmatpush.bf16.xpose.msra.mxu0 %v420_v31 }
 0x23d   :  { %1625 = vmatmul.msk.bf16.vlgmr.msra.gmra.mxu0 %vm209_vm9, %v413_v33 }
 0x298   :  { %v225_v35 = vpop.f32.mrf.mxu2 }
 0x299   :  { %v226_v36 = vadd.f32 %v225_v35, %v2132_v34 }
 0x29b   :  { %v230_v37 = vsel %vm48_vm0, %v226_v36, -inf }
 0x29c   :  { %231 = vmax.xlane.f32.xlu2 %v230_v37 }
 0x2a0   :  { %v227_v39 = vpop.f32.mrf.mxu2 }
 0x2a1   :  { %v2142_v40 = vadd.f32 %v227_v39, %v2139_v38 }
 0x2a2   :  { %v364_v44 = vpop.f32.mrf.mxu1 }
 0x2a3   :  { %v233_v41 = vsel %vm48_vm0, %v2142_v40, -inf  ;;  %v2149_v46 = vadd.f32 %v364_v44, %v2132_v34 }
 0x2a4   :  { %234 = vmax.xlane.f32.xlu1 %v233_v41 }
 0x2a5   :  { %v369_v49 = vsel %vm48_vm0, %v2149_v46, -inf }
 0x2aa   :  { %v297_v42 = vpop.f32.mrf.mxu0  ;;  %v366_v51 = vpop.f32.mrf.mxu1 }
 0x2ab   :  { %v298_v43 = vadd.f32 %v297_v42, %v2132_v34  ;;  %v2156_v52 = vadd.f32 %v366_v51, %v2139_v38 }
 0x2ad   :  { %v302_v45 = vsel %vm48_vm0, %v298_v43, -inf  ;;  %v372_v57 = vsel %vm48_vm0, %v2156_v52, -inf }
 0x2ae   :  { %303 = vmax.xlane.f32.xlu0 %v302_v45 }
 0x2b2   :  { %v299_v47 = vpop.f32.mrf.mxu0 }
 0x2b3   :  { %v300_v48 = vadd.f32 %v299_v47, %v2139_v38 }
 0x2b5   :  { %v305_v50 = vsel %vm48_vm0, %v300_v48, -inf }
 0x2b6   :  { %370 = vmax.xlane.f32.xlu0 %v369_v49  ;;  %306 = vmax.xlane.f32.xlu2 %v305_v50 }
 0x2ba   :  { %v431_v54 = vpop.f32.mrf.mxu0 }
 0x2bb   :  { %v432_v55 = vadd.f32 %v431_v54, %v2132_v34 }
 0x2bd   :  { %190 = vrot.lane.b32.xlu1 %v1838_v53, %s2001_s10  ;;  %v436_v56 = vsel %vm48_vm0, %v432_v55, -inf }
 0x2be   :  { %437 = vmax.xlane.f32.xlu0 %v436_v56  ;;  %373 = vmax.xlane.f32.xlu2 %v372_v57 }
 0x2c2   :  { %v433_v58 = vpop.f32.mrf.mxu0 }
 0x2c3   :  { %v434_v59 = vadd.f32 %v433_v58, %v2139_v38 }
 0x2c5   :  { %v439_v60 = vsel %vm48_vm0, %v434_v59, -inf }
 0x2c6   :  { %440 = vmax.xlane.f32.xlu2 %v439_v60 }
 0x30f   :  { %v232_v61 = vpop.xlane.xlu2 %231 }
 0x310   :  { %v236_v62 = vsub.f32 %v226_v36, %v232_v61 }
 0x312   :  { %v238_v63 = vmul.f32 1.442695, %v236_v62 }
 0x314   :  { %1866 = vpow2.f32 %v238_v63 }
 0x317   :  { %v235_v8 = vpop.xlane.xlu1 %234 }
 0x318   :  { %v237_v41 = vsub.f32 %v2142_v40, %v235_v8 }
 0x31a   :  { %v2168_v0 = vpop.eup %1866  ;;  %v240_v42 = vmul.f32 1.442695, %v237_v41 }
 0x31b   :  { %v242_v2 = vsel %vm48_vm0, %v2168_v0, 0.0 }
 0x31c   :  { %243 = vadd.xlane.f32.xlu0 %v242_v2 }
 0x321   :  { %v304_v3 = vpop.xlane.xlu0 %303 }
 0x322   :  { %v308_v4 = vsub.f32 %v298_v43, %v304_v3 }
 0x324   :  { %v310_v5 = vmul.f32 1.442695, %v308_v4 }
 0x326   :  { %1868 = vpow2.f32 %v310_v5 }
 0x329   :  { %v371_v9 = vpop.xlane.xlu0 %370  ;;  %v307_v10 = vpop.xlane.xlu2 %306 }
 0x32a   :  { %v309_v12 = vsub.f32 %v300_v48, %v307_v10  ;;  %v375_v37 = vsub.f32 %v2149_v46, %v371_v9 }
 0x32c   :  { %v2172_v13 = vpop.eup %1868  ;;  %v312_v14 = vmul.f32 1.442695, %v309_v12  ;;  %v377_v39 = vmul.f32 1.442695, %v375_v37 }
 0x32d   :  { %v314_v15 = vsel %vm48_vm0, %v2172_v13, 0.0 }
 0x32e   :  { %315 = vadd.xlane.f32.xlu1 %v314_v15  ;;  %1870 = vpow2.f32 %v312_v14 }
 0x32f   :  { %v191_v16 = vpop.permute.xlu1 %190 }
 0x330   :  { %v193_v17 = vadd.f32 %v191_v16, %v2106_v1  ;;  %v194_v18 = vadd.f32 %v191_v16, %v2110_v7 }
 0x331   :  { %v438_v19 = vpop.xlane.xlu0 %437  ;;  %v374_v20 = vpop.xlane.xlu2 %373 }
 0x332   :  { %v195_v22 = vpack.c.bf16 %v193_v17, %v193_v17  ;;  %v196_v23 = vpack.c.bf16 %v194_v18, %v194_v18  ;;  %v442_v24 = vsub.f32 %v432_v55, %v438_v19  ;;  %v376_v45 = vsub.f32 %v2156_v52, %v374_v20 }
 0x334   :  { %v255_v25 = vunpack.c.l.b16 %v195_v22  ;;  %v256_v26 = vunpack.c.l.b16 %v196_v23  ;;  %v444_v27 = vmul.f32 1.442695, %v442_v24  ;;  %v1871_v28 = vpop.eup %1870  ;;  %v379_v48 = vmul.f32 1.442695, %v376_v45 }
 0x335   :  { %v317_v30 = vsel %vm48_vm0, %v1871_v28, 0.0 }
 0x336   :  { %v257_v29 = vpack.c.b16 %v256_v26, %v255_v25  ;;  %1872 = vpow2.f32 %v444_v27  ;;  %318 = vadd.xlane.f32.xlu0 %v317_v30 }
 0x338   :  { %258 = vrot.lane.b32.xlu2 %v257_v29, %s2001_s10 }
 0x339   :  { %v441_v31 = vpop.xlane.xlu2 %440 }
 0x33a   :  { %v443_v1 = vsub.f32 %v434_v59, %v441_v31 }
 0x33c   :  { %v2180_v32 = vpop.eup %1872  ;;  %v446_v7 = vmul.f32 1.442695, %v443_v1 }
 0x33d   :  { %v448_v33 = vsel %vm48_vm0, %v2180_v32, 0.0 }
 0x33e   :  { %1874 = vpow2.f32 %v446_v7  ;;  %449 = vadd.xlane.f32.xlu1 %v448_v33  ;;  %v1757_v7 = vld [vmem:[%s2528_s4 + $0x10] sm:$0xff]  ;;  %v1756_v33 = vld [vmem:[%s2528_s4 + $0x8] sm:$0xff] }
 0x33f   :  { %1876 = vpow2.f32 %v377_v39  ;;  %536 = vmatpush.bf16.msra.mxu1 %v1757_v7 }
 0x340   :  { %1878 = vpow2.f32 %v240_v42 }
 0x341   :  { %1880 = vpow2.f32 %v379_v48 }
 0x343   :  { %537 = vmatpush.bf16.msra.mxu1 %v1756_v33 }
 0x344   :  { %v1875_v35 = vpop.eup %1874 }
 0x345   :  { %v451_v36 = vsel %vm48_vm0, %v1875_v35, 0.0  ;;  %v1877_v43 = vpop.eup %1876 }
 0x346   :  { %452 = vadd.xlane.f32.xlu1 %v451_v36  ;;  %v381_v44 = vsel %vm48_vm0, %v1877_v43, 0.0  ;;  %v1879_v47 = vpop.eup %1878 }
 0x347   :  { %v245_v49 = vsel %vm48_vm0, %v1879_v47, 0.0  ;;  %v1881_v46 = vpop.eup %1880 }
 0x348   :  { %v384_v40 = vsel %vm48_vm0, %v1881_v46, 0.0 }
 0x34a   :  { %325 = vrot.lane.b32.xlu0 %v257_v29, %s2002_s11 }
 0x35f   :  { %392 = vrot.lane.b32.xlu1 %v257_v29, %s2003_s12 }
 0x361   :  { %382 = vadd.xlane.f32.xlu2 %v381_v44 }
 0x369   :  { %246 = vadd.xlane.f32.xlu2 %v245_v49 }
 0x374   :  { %385 = vadd.xlane.f32.xlu0 %v384_v40 }
 0x381   :  { %459 = vrot.lane.b32.xlu2 %v257_v29, %s2004_s13 }
 0x38f   :  { %v244_v51 = vpop.xlane.xlu0 %243 }
 0x392   :  { %v259_v50 = vpop.permute.xlu2 %258 }
 0x393   :  { %271 = vmatpush.bf16.msrb.mxu2 %v259_v50 }
 0x3a1   :  { %v316_v54 = vpop.xlane.xlu1 %315 }
 0x3a9   :  { %v319_v53 = vpop.xlane.xlu0 %318 }
 0x3aa   :  { %1882 = vrcp.f32 %v319_v53  ;;  %v1839_v53 = vld [vmem:[%s2525_s1 + $0xc] ss:$0 sm:$0xff] }
 0x3ab   :  { %1884 = vrcp.f32 %v316_v54 }
 0x3b0   :  { %v1883_v52 = vpop.eup %1882 }
 0x3b1   :  { %v1885_v55 = vpop.eup %1884  ;;  %v323_v56 = vmul.f32 %v1883_v52, %v1871_v28  ;;  %v450_v59 = vpop.xlane.xlu1 %449 }
 0x3b2   :  { %v322_v58 = vmul.f32 %v1885_v55, %v2172_v13 }
 0x3b4   :  { %v324_v60 = vpack.c.bf16 %v323_v56, %v322_v58 }
 0x3b9   :  { %v453_v61 = vpop.xlane.xlu1 %452 }
 0x3ba   :  { %1886 = vrcp.f32 %v453_v61 }
 0x3bb   :  { %1888 = vrcp.f32 %v244_v51 }
 0x3bc   :  { %v326_v57 = vpop.permute.xlu0 %325  ;;  %1890 = vrcp.f32 %v450_v59 }
 0x3bd   :  { %338 = vmatpush.bf16.msra.mxu3 %v326_v57 }
 0x3c0   :  { %1622 = vmatmul.msk.bf16.vlgmr.msra.gmra.mxu3 %vm48_vm0, %v324_v60  ;;  %v1887_v3 = vpop.eup %1886 }
 0x3c1   :  { %v1889_v4 = vpop.eup %1888  ;;  %v457_v8 = vmul.f32 %v1887_v3, %v1875_v35 }
 0x3c2   :  { %v1891_v5 = vpop.eup %1890  ;;  %v250_v10 = vmul.f32 %v1889_v4, %v2168_v0 }
 0x3c3   :  { %v456_v12 = vmul.f32 %v1891_v5, %v2180_v32 }
 0x3c5   :  { %v458_v16 = vpack.c.bf16 %v457_v8, %v456_v12 }
 0x3d1   :  { %v393_v62 = vpop.permute.xlu1 %392 }
 0x3d2   :  { %405 = vmatpush.bf16.msra.mxu2 %v393_v62 }
 0x3d4   :  { %v383_v63 = vpop.xlane.xlu2 %382 }
 0x3dc   :  { %v247_v2 = vpop.xlane.xlu2 %246 }
 0x3dd   :  { %1892 = vrcp.f32 %v247_v2 }
 0x3e3   :  { %v1893_v9 = vpop.eup %1892 }
 0x3e4   :  { %v251_v13 = vmul.f32 %v1893_v9, %v1879_v47  ;;  %v460_v14 = vpop.permute.xlu2 %459 }
 0x3e5   :  { %472 = vmatpush.bf16.msrb.mxu3 %v460_v14 }
 0x3e6   :  { %v252_v15 = vpack.c.bf16 %v251_v13, %v250_v10  ;;  %v1758_v10 = vld [vmem:[%s2529_s5] sm:$0xff] }
 0x3e7   :  { %v386_v17 = vpop.xlane.xlu0 %385 }
 0x3e8   :  { %1620 = vmatmul.msk.bf16.vlgmr.msrb.gmra.mxu2 %vm48_vm0, %v252_v15  ;;  %1626 = vmatmul.msk.bf16.vlgmr.msrb.gmra.mxu3 %vm48_vm0, %v458_v16  ;;  %1894 = vrcp.f32 %v386_v17 }
 0x3e9   :  { %1896 = vrcp.f32 %v383_v63 }
 0x3ee   :  { %v1895_v18 = vpop.eup %1894 }
 0x3ef   :  { %v1897_v19 = vpop.eup %1896  ;;  %v390_v20 = vmul.f32 %v1895_v18, %v1881_v46 }
 0x3f0   :  { %v389_v22 = vmul.f32 %v1897_v19, %v1877_v43 }
 0x3f2   :  { %v391_v23 = vpack.c.bf16 %v390_v20, %v389_v22 }
 0x3f8   :  { %1624 = vmatmul.msk.bf16.vlgmr.msra.gmra.mxu2 %vm48_vm0, %v391_v23 }
 0x443   :  { %v340_v0 = vpop.f32.mrf.mxu3 }
 0x44b   :  { %v342_v24 = vpop.f32.mrf.mxu3 }
 0x44c   :  { %v1803_v25 = vpack.i.bf16 %v342_v24, %v340_v0 }
 0x44e   :  { %1804 = vrot.lane.b32.xlu0 %v1803_v25, %s2005_s15 }
 0x46b   :  { %v273_v26 = vpop.f32.mrf.mxu2  ;;  %v474_v29 = vpop.f32.mrf.mxu3 }
 0x473   :  { %v275_v27 = vpop.f32.mrf.mxu2  ;;  %v476_v1 = vpop.f32.mrf.mxu3 }
 0x474   :  { %v1813_v32 = vpack.i.bf16 %v476_v1, %v474_v29 }
 0x47b   :  { %v407_v28 = vpop.f32.mrf.mxu2 }
 0x483   :  { %v409_v30 = vpop.f32.mrf.mxu2 }
 0x484   :  { %v1808_v31 = vpack.i.bf16 %v409_v30, %v407_v28 }
 0x486   :  { %1809 = vrot.lane.b32.xlu1 %v1808_v31, %s2006_s16 }
 0x48e   :  { %1814 = vrot.lane.b32.xlu1 %v1813_v32, %s2532_s17  ;;  %v1840_v32 = vld [vmem:[%s2525_s1 + $0xd] ss:$0 sm:$0xff] }
 0x4c0   :  { %v1805_v36 = vpop.permute.xlu0 %1804 }
 0x4c1   :  { %v1807_v37 = vunpack.i.h.bf16 %v1805_v36  ;;  %v1806_v39 = vunpack.i.l.bf16 %v1805_v36 }
 0x4c3   :  { %v503_v44 = vsel %vm209_vm9, %v273_v26, %v1806_v39  ;;  %v504_v45 = vsel %vm209_vm9, %v275_v27, %v1807_v37 }
 0x4f8   :  { %v1810_v35 = vpop.permute.xlu1 %1809 }
 0x4f9   :  { %v1812_v41 = vunpack.i.h.bf16 %v1810_v35  ;;  %v1811_v42 = vunpack.i.l.bf16 %v1810_v35 }
 0x4fb   :  { %v506_v49 = vsel %vm48_vm0, %v504_v45, %v1812_v41  ;;  %v505_v46 = vsel %vm48_vm0, %v503_v44, %v1811_v42  ;;  %v1841_v41 = vld [vmem:[%s2525_s1 + $0xe] ss:$0 sm:$0xff] }
 0x500   :  { %v1815_v43 = vpop.permute.xlu1 %1814 }
 0x501   :  { %v1817_v47 = vunpack.i.h.bf16 %v1815_v43  ;;  %v1816_v48 = vunpack.i.l.bf16 %v1815_v43 }
 0x503   :  { %v509_v40 = vsel %vm507_vm10, %v506_v49, %v1817_v47  ;;  %v508_v50 = vsel %vm507_vm10, %v505_v46, %v1816_v48  ;;  %v1767_v47 = vld [vmem:[%s2528_s4 + $0x60] sm:$0xff]  ;;  %v1766_v48 = vld [vmem:[%s2528_s4 + $0x58] sm:$0xff]  ;;  %v1765_v49 = vld [vmem:[%s2528_s4 + $0x50] sm:$0xff] }
 0x504   :  { %v510_v51 = vpack.c.bf16 %v509_v40, %v508_v50  ;;  %721 = vmatpush.bf16.msrb.mxu0 %v1767_v47  ;;  %v1764_v46 = vld [vmem:[%s2528_s4 + $0x48] sm:$0xff]  ;;  %v1763_v40 = vld [vmem:[%s2528_s4 + $0x40] sm:$0xff]  ;;  %v1762_v50 = vld [vmem:[%s2528_s4 + $0x38] sm:$0xff] }
 0x506   :  { %1635 = vmatmul.msk.bf16.vlgmr.msra.gmra.mxu1 %vm76_vm1, %v510_v51  ;;  %v1761_v51 = vld [vmem:[%s2528_s4 + $0x30] sm:$0xff] }
 0x508   :  { %722 = vmatpush.bf16.msrb.mxu0 %v1766_v48 }
 0x50c   :  { %723 = vmatpush.bf16.msrb.mxu0 %v1765_v49 }
 0x510   :  { %724 = vmatpush.bf16.msrb.mxu0 %v1764_v46 }
 0x514   :  { %725 = vmatpush.bf16.msrb.mxu0 %v1763_v40 }
 0x518   :  { %726 = vmatpush.bf16.msrb.mxu0 %v1762_v50 }
 0x51c   :  { %727 = vmatpush.bf16.msrb.mxu0 %v1761_v51 }
 0x583   :  { %v539_v54 = vpop.f32.mrf.mxu1 }
 0x584   :  { %v544_v52 = vadd.f32 %v539_v54, %v2064_v6  ;;  %v1842_v54 = vld [vmem:[%s2526_s2 + $0x10] ss:$0 sm:$0xff] }
 0x586   :  { %v2221_v55 = vadd.f32 %v1839_v53, %v544_v52 }
 0x588   :  { %v549_v56 = vsel %vm76_vm1, %v2221_v55, 0.0  ;;  %v557_v57 = vmul.f32 %v2221_v55, %v2221_v55 }
 0x589   :  { %550 = vadd.xlane.f32.xlu0 %v549_v56 }
 0x58a   :  { %v559_v58 = vsel %vm76_vm1, %v557_v57, 0.0 }
 0x58b   :  { %560 = vadd.xlane.f32.xlu1 %v559_v58  ;;  %v541_v59 = vpop.f32.mrf.mxu1 }
 0x58c   :  { %v545_v60 = vadd.f32 %v541_v59, %v2071_v11  ;;  %v1759_v11 = vld [vmem:[%s2529_s5 + $0x8] sm:$0xff] }
 0x58d   :  { %630 = vmatpush.bf16.msrb.mxu2 %v1759_v11 }
 0x58e   :  { %v2229_v61 = vadd.f32 %v1839_v53, %v545_v60  ;;  %v1760_v53 = vld [vmem:[%s2528_s4 + $0x28] sm:$0xff] }
 0x58f   :  { %728 = vmatpush.bf16.msrb.mxu0 %v1760_v53 }
 0x590   :  { %v552_v6 = vsel %vm76_vm1, %v2229_v61, 0.0  ;;  %v558_v62 = vmul.f32 %v2229_v61, %v2229_v61 }
 0x591   :  { %553 = vadd.xlane.f32.xlu2 %v552_v6  ;;  %631 = vmatpush.bf16.msrb.mxu2 %v1758_v10 }
 0x592   :  { %v562_v63 = vsel %vm76_vm1, %v558_v62, 0.0 }
 0x593   :  { %563 = vadd.xlane.f32.xlu0 %v562_v63 }
 0x5fc   :  { %v551_v2 = vpop.xlane.xlu0 %550 }
 0x5fd   :  { %v555_v3 = vmul.f32 %v551_v2, %v2078_v21 }
 0x5fe   :  { %v561_v4 = vpop.xlane.xlu1 %560 }
 0x5ff   :  { %v567_v5 = vmul.f32 %v555_v3, %v555_v3  ;;  %v565_v8 = vmul.f32 %v561_v4, %v2078_v21  ;;  %v571_v31 = vsub.f32 %v2221_v55, %v555_v3 }
 0x601   :  { %v569_v9 = vsub.f32 %v565_v8, %v567_v5 }
 0x603   :  { %v573_v12 = vadd.f32 1e-05, %v569_v9 }
 0x604   :  { %v554_v13 = vpop.xlane.xlu2 %553 }
 0x605   :  { %1898 = vrsqrt.f32 %v573_v12  ;;  %v556_v14 = vmul.f32 %v554_v13, %v2078_v21  ;;  %vm581_vm12 = vweird.f32 %v573_v12 }
 0x606   :  { %v564_v15 = vpop.xlane.xlu0 %563 }
 0x607   :  { %v568_v16 = vmul.f32 %v556_v14, %v556_v14  ;;  %v566_v17 = vmul.f32 %v564_v15, %v2078_v21  ;;  %v572_v35 = vsub.f32 %v2229_v61, %v556_v14 }
 0x609   :  { %v570_v18 = vsub.f32 %v566_v17, %v568_v16 }
 0x60b   :  { %v1899_v19 = vpop.eup %1898  ;;  %v574_v20 = vadd.f32 1e-05, %v570_v18  ;;  %v1843_v18 = vld [vmem:[%s2525_s1 + $0xf] ss:$0 sm:$0xff] }
 0x60c   :  { %v576_v22 = vmul.f32 %v1899_v19, %v573_v12  ;;  %vm582_vm11 = vweird.f32 %v1899_v19 }
 0x60d   :  { %1900 = vrsqrt.f32 %v574_v20  ;;  %vm583_vm13 = vmor %vm581_vm12, %vm582_vm11  ;;  %vm591_vm15 = vweird.f32 %v574_v20 }
 0x60e   :  { %v577_v23 = vmul.f32 %v1899_v19, %v576_v22 }
 0x610   :  { %v578_v0 = vmul.f32 0.5, %v577_v23 }
 0x612   :  { %v579_v24 = vsub.f32 1.5, %v578_v0 }
 0x613   :  { %v1901_v25 = vpop.eup %1900 }
 0x614   :  { %v580_v26 = vmul.f32 %v1899_v19, %v579_v24  ;;  %v586_v27 = vmul.f32 %v1901_v25, %v574_v20  ;;  %vm592_vm14 = vweird.f32 %v1901_v25 }
 0x615   :  { %vm593_vm2 = vmor %vm591_vm15, %vm592_vm14 }
 0x616   :  { %v587_v28 = vmul.f32 %v1901_v25, %v586_v27  ;;  %v584_v29 = vsel %vm583_vm13, %v1899_v19, %v580_v26 }
 0x617   :  { %v595_v7 = vmul.f32 %v584_v29, %v571_v31 }
 0x618   :  { %v588_v30 = vmul.f32 0.5, %v587_v28 }
 0x619   :  { %v598_v37 = vmul.f32 %v1840_v32, %v595_v7 }
 0x61a   :  { %v589_v1 = vsub.f32 1.5, %v588_v30 }
 0x61b   :  { %v601_v43 = vadd.f32 %v1841_v41, %v598_v37 }
 0x61c   :  { %v590_v33 = vmul.f32 %v1901_v25, %v589_v1 }
 0x61e   :  { %v594_v36 = vsel %vm593_vm2, %v1901_v25, %v590_v33 }
 0x61f   :  { %v596_v39 = vmul.f32 %v594_v36, %v572_v35  ;;  %v1768_v35 = vld [vmem:[%s2527_s3 + $0x10] sm:$0xff] }
 0x621   :  { %v599_v42 = vmul.f32 %v1840_v32, %v596_v39 }
 0x623   :  { %v602_v44 = vadd.f32 %v1841_v41, %v599_v42 }
 0x625   :  { %v603_v45 = vpack.c.bf16 %v602_v44, %v601_v43  ;;  %v1846_v44 = vld [vmem:[%s2525_s1 + $0x13] ss:$0 sm:$0xff] }
 0x627   :  { %1644 = vmatmul.msk.bf16.vlgmr.msrb.gmra.mxu2 %vm76_vm1, %v603_v45 }
 0x6aa   :  { %v633_v52 = vpop.f32.mrf.mxu2 }
 0x6ab   :  { %v634_v56 = vadd.f32 %v1842_v54, %v633_v52 }
 0x6ad   :  { %v640_v57 = vmul.f32 0.044715, %v634_v56  ;;  %v638_v12 = vmul.f32 0.5, %v634_v56 }
 0x6af   :  { %v642_v58 = vmul.f32 %v640_v57, %v634_v56 }
 0x6b1   :  { %v644_v59 = vmul.f32 %v642_v58, %v634_v56 }
 0x6b2   :  { %v635_v60 = vpop.f32.mrf.mxu2 }
 0x6b3   :  { %v646_v6 = vadd.f32 %v644_v59, %v634_v56  ;;  %v636_v62 = vadd.f32 %v1842_v54, %v635_v60  ;;  %v1844_v60 = vld [vmem:[%s2525_s1 + $0x10] ss:$0 sm:$0xff] }
 0x6b5   :  { %v641_v63 = vmul.f32 0.044715, %v636_v62  ;;  %v648_v2 = vmul.f32 0.7978846, %v646_v6  ;;  %v639_v13 = vmul.f32 0.5, %v636_v62 }
 0x6b7   :  { %v643_v3 = vmul.f32 %v641_v63, %v636_v62  ;;  %1902 = vtanh.f32 %v648_v2 }
 0x6b9   :  { %v645_v4 = vmul.f32 %v643_v3, %v636_v62 }
 0x6bb   :  { %v647_v5 = vadd.f32 %v645_v4, %v636_v62 }
 0x6bd   :  { %v649_v8 = vmul.f32 0.7978846, %v647_v5  ;;  %v1903_v11 = vpop.eup %1902  ;;  %v1845_v5 = vld [vmem:[%s2525_s1 + $0x11] ss:$0 sm:$0xff] }
 0x6be   :  { %v652_v9 = vadd.f32 1.0, %v1903_v11 }
 0x6bf   :  { %1904 = vtanh.f32 %v649_v8 }
 0x6c0   :  { %v654_v15 = vmul.f32 %v652_v9, %v638_v12 }
 0x6c5   :  { %v1905_v10 = vpop.eup %1904 }
 0x6c6   :  { %v653_v14 = vadd.f32 1.0, %v1905_v10 }
 0x6c8   :  { %v655_v16 = vmul.f32 %v653_v14, %v639_v13 }
 0x6ca   :  { %v656_v17 = vpack.c.bf16 %v655_v16, %v654_v15 }
 0x6cc   :  { %729 = vmatmul.bf16.vlgmr.msrb.gmra.mxu0 %v656_v17 }
 0x749   :  { %v730_v19 = vpop.f32.mrf.mxu0 }
 0x74a   :  { %v735_v20 = vadd.f32 %v730_v19, %v2221_v55 }
 0x74c   :  { %v2286_v22 = vadd.f32 %v1843_v18, %v735_v20 }
 0x74e   :  { %v750_v23 = vsel %vm76_vm1, %v2286_v22, 0.0  ;;  %v758_v0 = vmul.f32 %v2286_v22, %v2286_v22 }
 0x74f   :  { %751 = vadd.xlane.f32.xlu2 %v750_v23 }
 0x750   :  { %v760_v24 = vsel %vm76_vm1, %v758_v0, 0.0  ;;  %v1847_v0 = vld [vmem:[%s2525_s1 + $0x12] ss:$0 sm:$0xff] }
 0x751   :  { %761 = vadd.xlane.f32.xlu0 %v760_v24  ;;  %v732_v25 = vpop.f32.mrf.mxu0 }
 0x752   :  { %v736_v26 = vadd.f32 %v732_v25, %v2229_v61  ;;  %v1769_v61 = vld [vmem:[%s2527_s3 + $0x18] sm:$0xff] }
 0x753   :  { %830 = vmatpush.bf16.msra.mxu3 %v1769_v61 }
 0x754   :  { %v2294_v27 = vadd.f32 %v1843_v18, %v736_v26 }
 0x756   :  { %v753_v55 = vsel %vm76_vm1, %v2294_v27, 0.0  ;;  %v759_v28 = vmul.f32 %v2294_v27, %v2294_v27 }
 0x757   :  { %754 = vadd.xlane.f32.xlu1 %v753_v55  ;;  %831 = vmatpush.bf16.msra.mxu3 %v1768_v35 }
 0x758   :  { %v763_v29 = vsel %vm76_vm1, %v759_v28, 0.0 }
 0x759   :  { %764 = vadd.xlane.f32.xlu2 %v763_v29 }
 0x770   :  { %847 = vrot.lane.b32.xlu1 %v1846_v44, %s1993_s14 }
 0x7c2   :  { %v752_v30 = vpop.xlane.xlu2 %751 }
 0x7c3   :  { %v756_v31 = vmul.f32 %v752_v30, %v2078_v21 }
 0x7c4   :  { %v762_v1 = vpop.xlane.xlu0 %761 }
 0x7c5   :  { %v768_v32 = vmul.f32 %v756_v31, %v756_v31  ;;  %v766_v7 = vmul.f32 %v762_v1, %v2078_v21  ;;  %v772_v58 = vsub.f32 %v2286_v22, %v756_v31 }
 0x7c7   :  { %v770_v33 = vsub.f32 %v766_v7, %v768_v32 }
 0x7c9   :  { %v774_v36 = vadd.f32 1e-05, %v770_v33 }
 0x7ca   :  { %v755_v37 = vpop.xlane.xlu1 %754 }
 0x7cb   :  { %1906 = vrsqrt.f32 %v774_v36  ;;  %v757_v39 = vmul.f32 %v755_v37, %v2078_v21  ;;  %vm782_vm4 = vweird.f32 %v774_v36 }
 0x7cc   :  { %v765_v41 = vpop.xlane.xlu2 %764 }
 0x7cd   :  { %v769_v42 = vmul.f32 %v757_v39, %v757_v39  ;;  %v767_v43 = vmul.f32 %v765_v41, %v2078_v21  ;;  %v773_v63 = vsub.f32 %v2294_v27, %v757_v39  ;;  %v1848_v41 = vld [vmem:[%s2525_s1 + $0x14] ss:$0 sm:$0xff] }
 0x7cf   :  { %v771_v45 = vsub.f32 %v767_v43, %v769_v42 }
 0x7d1   :  { %v1907_v47 = vpop.eup %1906  ;;  %v775_v48 = vadd.f32 1e-05, %v771_v45 }
 0x7d2   :  { %v777_v49 = vmul.f32 %v1907_v47, %v774_v36  ;;  %vm783_vm3 = vweird.f32 %v1907_v47 }
 0x7d3   :  { %1908 = vrsqrt.f32 %v775_v48  ;;  %vm784_vm5 = vmor %vm782_vm4, %vm783_vm3  ;;  %vm792_vm7 = vweird.f32 %v775_v48 }
 0x7d4   :  { %v778_v46 = vmul.f32 %v1907_v47, %v777_v49 }
 0x7d6   :  { %v779_v40 = vmul.f32 0.5, %v778_v46 }
 0x7d8   :  { %v780_v50 = vsub.f32 1.5, %v779_v40 }
 0x7d9   :  { %v1909_v51 = vpop.eup %1908 }
 0x7da   :  { %v781_v53 = vmul.f32 %v1907_v47, %v780_v50  ;;  %v787_v54 = vmul.f32 %v1909_v51, %v775_v48  ;;  %vm793_vm6 = vweird.f32 %v1909_v51 }
 0x7db   :  { %vm794_vm8 = vmor %vm792_vm7, %vm793_vm6  ;;  %vm1492_vm6 = vcmask 31744  }
 0x7dc   :  { %v788_v52 = vmul.f32 %v1909_v51, %v787_v54  ;;  %v785_v56 = vsel %vm784_vm5, %v1907_v47, %v781_v53 }
 0x7dd   :  { %v796_v6 = vmul.f32 %v785_v56, %v772_v58 }
 0x7de   :  { %v789_v57 = vmul.f32 0.5, %v788_v52 }
 0x7df   :  { %v799_v3 = vmul.f32 %v1844_v60, %v796_v6 }
 0x7e0   :  { %v790_v59 = vsub.f32 1.5, %v789_v57 }
 0x7e1   :  { %v802_v11 = vadd.f32 %v1845_v5, %v799_v3 }
 0x7e2   :  { %v791_v62 = vmul.f32 %v1909_v51, %v790_v59  ;;  %v848_v13 = vpop.permute.xlu1 %847 }
 0x7e4   :  { %v795_v2 = vsel %vm794_vm8, %v1909_v51, %v791_v62 }
 0x7e5   :  { %v797_v4 = vmul.f32 %v795_v2, %v773_v63 }
 0x7e7   :  { %v800_v8 = vmul.f32 %v1844_v60, %v797_v4 }
 0x7e9   :  { %v803_v9 = vadd.f32 %v1845_v5, %v800_v8 }
 0x7eb   :  { %v804_v10 = vpack.c.bf16 %v803_v9, %v802_v11 }
 0x7ed   :  { %1685 = vmatmul.msk.bf16.vlgmr.msra.gmra.mxu3 %vm76_vm1, %v804_v10 }
 0x870   :  { %v833_v12 = vpop.f32.mrf.mxu3 }
 0x871   :  { %v850_v14 = vadd.f32 %v848_v13, %v833_v12  ;;  %v839_v25 = vadd.f32 %v1847_v0, %v833_v12 }
 0x873   :  { %v852_v16 = vpack.c.bf16 %v850_v14, %v850_v14  ;;  %v841_v55 = vmul.f32 0.35355338, %v839_v25 }
 0x875   :  { %v870_v19 = vunpack.c.l.b16 %v852_v16  ;;  %v843_v30 = vpack.c.bf16 %v841_v55, %v841_v55 }
 0x877   :  { %v865_v32 = vunpack.c.l.b16 %v843_v30 }
 0x878   :  { %v835_v15 = vpop.f32.mrf.mxu3 }
 0x879   :  { %v851_v17 = vadd.f32 %v848_v13, %v835_v15  ;;  %v840_v24 = vadd.f32 %v1847_v0, %v835_v15 }
 0x87b   :  { %v853_v18 = vpack.c.bf16 %v851_v17, %v851_v17  ;;  %v842_v26 = vmul.f32 0.35355338, %v840_v24 }
 0x87d   :  { %v871_v20 = vunpack.c.l.b16 %v853_v18  ;;  %v844_v28 = vpack.c.bf16 %v842_v26, %v842_v26 }
 0x87f   :  { %v872_v23 = vpack.c.b16 %v871_v20, %v870_v19  ;;  %v866_v1 = vunpack.c.l.b16 %v844_v28 }
 0x881   :  { %873 = vrot.lane.b32.xlu0 %v872_v23, %s1995_s22  ;;  %v867_v7 = vpack.c.b16 %v866_v1, %v865_v32 }
 0x8f3   :  { %v874_v29 = vpop.permute.xlu0 %873 }
 0x8f4   :  { %v879_v31 = vsel %vm209_vm9, %v874_v29, 0 }
 0x8f5   :  { %888 = vmatpush.bf16.xpose.msrb.mxu1 %v879_v31 }
 0x8fc   :  { %1686 = vmatmul.msk.bf16.vlgmr.msrb.gmra.mxu1 %vm209_vm9, %v867_v7 }
 0x979   :  { %v890_v61 = vpop.f32.mrf.mxu1 }
 0x97a   :  { %v891_v33 = vadd.f32 %v890_v61, %v2132_v34 }
 0x97c   :  { %v895_v35 = vsel %vm48_vm0, %v891_v33, -inf }
 0x97d   :  { %896 = vmax.xlane.f32.xlu2 %v895_v35 }
 0x981   :  { %v892_v36 = vpop.f32.mrf.mxu1 }
 0x982   :  { %v893_v37 = vadd.f32 %v892_v36, %v2139_v38 }
 0x984   :  { %v898_v39 = vsel %vm48_vm0, %v893_v37, -inf }
 0x985   :  { %899 = vmax.xlane.f32.xlu2 %v898_v39 }
 0x99d   :  { %856 = vrot.lane.b32.xlu2 %v1848_v41, %s2001_s10 }
 0x9a5   :  { %945 = vrot.lane.b32.xlu2 %v872_v23, %s1994_s21  ;;  %s2533_s21 = smov 24  }
 0x9f0   :  { %v897_v42 = vpop.xlane.xlu2 %896 }
 0x9f1   :  { %v901_v43 = vsub.f32 %v891_v33, %v897_v42 }
 0x9f3   :  { %v903_v44 = vmul.f32 1.442695, %v901_v43 }
 0x9f5   :  { %1910 = vpow2.f32 %v903_v44 }
 0x9f8   :  { %v900_v45 = vpop.xlane.xlu2 %899 }
 0x9f9   :  { %v902_v47 = vsub.f32 %v893_v37, %v900_v45 }
 0x9fb   :  { %v1911_v48 = vpop.eup %1910  ;;  %v905_v49 = vmul.f32 1.442695, %v902_v47 }
 0x9fc   :  { %v907_v46 = vsel %vm48_vm0, %v1911_v48, 0.0 }
 0x9fd   :  { %1912 = vpow2.f32 %v905_v49  ;;  %908 = vadd.xlane.f32.xlu0 %v907_v46 }
 0xa00   :  { %v857_v40 = vpop.permute.xlu2 %856 }
 0xa01   :  { %v859_v50 = vadd.f32 %v857_v40, %v833_v12  ;;  %v860_v51 = vadd.f32 %v857_v40, %v835_v15 }
 0xa03   :  { %v1913_v53 = vpop.eup %1912  ;;  %v861_v54 = vpack.c.bf16 %v859_v50, %v859_v50  ;;  %v862_v52 = vpack.c.bf16 %v860_v51, %v860_v51 }
 0xa04   :  { %v910_v56 = vsel %vm48_vm0, %v1913_v53, 0.0 }
 0xa05   :  { %v920_v57 = vunpack.c.l.b16 %v861_v54  ;;  %v921_v58 = vunpack.c.l.b16 %v862_v52  ;;  %911 = vadd.xlane.f32.xlu1 %v910_v56 }
 0xa07   :  { %v2341_v59 = vpack.c.b16 %v921_v58, %v920_v57 }
 0xa08   :  { %v946_v60 = vpop.permute.xlu2 %945 }
 0xa09   :  { %v951_v6 = vsel %vm209_vm9, %v946_v60, 0  ;;  %923 = vrot.lane.b32.xlu2 %v2341_v59, %s2001_s10 }
 0xa0a   :  { %960 = vmatpush.bf16.xpose.msrb.mxu3 %v951_v6 }
 0xa11   :  { %1012 = vrot.lane.b32.xlu0 %v872_v23, %s1997_s24  ;;  %943 = vrot.lane.b32.xlu2 %v867_v7, %s1996_s23  ;;  %s1594_s24 = sshll.u32 %s2531_s7, 4  ;;  %s1595_s24 = int_to_ptr.hbm [resolvable:$true] %s1594_s24 }
 0xa19   :  { %1079 = vrot.lane.b32.xlu2 %v872_v23, %s1999_s26 }
 0xa1e   :  { %1010 = vrot.lane.b32.xlu1 %v867_v7, %s2000_s27 }
 0xa21   :  { %1077 = vrot.lane.b32.xlu2 %v867_v7, %s1998_s25 }
 0xa63   :  { %v924_v62 = vpop.permute.xlu2 %923 }
 0xa64   :  { %936 = vmatpush.bf16.msra.mxu2 %v924_v62 }
 0xa6b   :  { %v944_v63 = vpop.permute.xlu2 %943 }
 0xa6c   :  { %1688 = vmatmul.msk.bf16.vlgmr.msrb.gmra.mxu3 %vm209_vm9, %v944_v63 }
 0xa70   :  { %v909_v3 = vpop.xlane.xlu0 %908 }
 0xa71   :  { %1914 = vrcp.f32 %v909_v3 }
 0xa73   :  { %v1080_v2 = vpop.permute.xlu2 %1079 }
 0xa74   :  { %v1085_v4 = vsel %vm209_vm9, %v1080_v2, 0 }
 0xa75   :  { %1094 = vmatpush.bf16.xpose.msra.mxu3 %v1085_v4 }
 0xa77   :  { %v1915_v11 = vpop.eup %1914 }
 0xa78   :  { %v912_v5 = vpop.xlane.xlu1 %911  ;;  %v915_v10 = vmul.f32 %v1915_v11, %v1911_v48 }
 0xa79   :  { %1916 = vrcp.f32 %v912_v5 }
 0xa7b   :  { %v1078_v8 = vpop.permute.xlu2 %1077 }
 0xa7c   :  { %1692 = vmatmul.msk.bf16.vlgmr.msra.gmra.mxu3 %vm209_vm9, %v1078_v8 }
 0xa7f   :  { %v1917_v9 = vpop.eup %1916 }
 0xa80   :  { %v916_v12 = vmul.f32 %v1917_v9, %v1913_v53 }
 0xa82   :  { %v917_v13 = vpack.c.bf16 %v916_v12, %v915_v10 }
 0xa83   :  { %v1013_v14 = vpop.permute.xlu0 %1012 }
 0xa84   :  { %v1018_v15 = vsel %vm209_vm9, %v1013_v14, 0  ;;  %1687 = vmatmul.msk.bf16.vlgmr.msra.gmra.mxu2 %vm48_vm0, %v917_v13 }
 0xa85   :  { %1027 = vmatpush.bf16.xpose.msrb.mxu2 %v1018_v15 }
 0xa90   :  { %v1011_v16 = vpop.permute.xlu1 %1010 }
 0xa94   :  { %1690 = vmatmul.msk.bf16.vlgmr.msrb.gmra.mxu2 %vm209_vm9, %v1011_v16 }
 0xaef   :  { %v962_v17 = vpop.f32.mrf.mxu3 }
 0xaf0   :  { %v963_v18 = vadd.f32 %v962_v17, %v2132_v34 }
 0xaf2   :  { %v967_v19 = vsel %vm48_vm0, %v963_v18, -inf }
 0xaf3   :  { %968 = vmax.xlane.f32.xlu2 %v967_v19 }
 0xaf7   :  { %v964_v20 = vpop.f32.mrf.mxu3 }
 0xaf8   :  { %v965_v23 = vadd.f32 %v964_v20, %v2139_v38 }
 0xafa   :  { %v970_v0 = vsel %vm48_vm0, %v965_v23, -inf }
 0xafb   :  { %971 = vmax.xlane.f32.xlu0 %v970_v0 }
 0xaff   :  { %v1096_v24 = vpop.f32.mrf.mxu3 }
 0xb00   :  { %v1097_v25 = vadd.f32 %v1096_v24, %v2132_v34 }
 0xb02   :  { %v1101_v26 = vsel %vm48_vm0, %v1097_v25, -inf }
 0xb03   :  { %1102 = vmax.xlane.f32.xlu0 %v1101_v26 }
 0xb07   :  { %v2363_v55 = vpop.f32.mrf.mxu2  ;;  %v1098_v61 = vpop.f32.mrf.mxu3 }
 0xb08   :  { %v1099_v33 = vadd.f32 %v1098_v61, %v2139_v38 }
 0xb0a   :  { %v1104_v35 = vsel %vm48_vm0, %v1099_v33, -inf }
 0xb0f   :  { %v2365_v28 = vpop.f32.mrf.mxu2 }
 0xb17   :  { %v1029_v29 = vpop.f32.mrf.mxu2 }
 0xb18   :  { %v1030_v30 = vadd.f32 %v1029_v29, %v2132_v34 }
 0xb1a   :  { %v1034_v31 = vsel %vm48_vm0, %v1030_v30, -inf }
 0xb1b   :  { %1035 = vmax.xlane.f32.xlu1 %v1034_v31 }
 0xb1f   :  { %v1031_v1 = vpop.f32.mrf.mxu2 }
 0xb20   :  { %v1032_v32 = vadd.f32 %v1031_v1, %v2139_v38 }
 0xb22   :  { %v1037_v7 = vsel %vm48_vm0, %v1032_v32, -inf }
 0xb23   :  { %1038 = vmax.xlane.f32.xlu2 %v1037_v7 }
 0xb2b   :  { %1105 = vmax.xlane.f32.xlu2 %v1104_v35 }
 0xb43   :  { %990 = vrot.lane.b32.xlu2 %v2341_v59, %s2002_s11 }
 0xb66   :  { %v969_v36 = vpop.xlane.xlu2 %968 }
 0xb67   :  { %v973_v34 = vsub.f32 %v963_v18, %v969_v36 }
 0xb69   :  { %v975_v37 = vmul.f32 1.442695, %v973_v34 }
 0xb6b   :  { %1918 = vpow2.f32 %v975_v37 }
 0xb6e   :  { %v972_v39 = vpop.xlane.xlu0 %971 }
 0xb6f   :  { %v974_v41 = vsub.f32 %v965_v23, %v972_v39 }
 0xb71   :  { %v1919_v42 = vpop.eup %1918  ;;  %v977_v43 = vmul.f32 1.442695, %v974_v41  ;;  %v1771_v41 = vld [vmem:[%s2528_s4 + $0x20] sm:$0xff] }
 0xb72   :  { %v979_v44 = vsel %vm48_vm0, %v1919_v42, 0.0  ;;  %1200 = vmatpush.bf16.msra.mxu2 %v1771_v41 }
 0xb73   :  { %1920 = vpow2.f32 %v977_v43  ;;  %980 = vadd.xlane.f32.xlu0 %v979_v44 }
 0xb76   :  { %v1103_v45 = vpop.xlane.xlu0 %1102 }
 0xb77   :  { %v1107_v38 = vsub.f32 %v1097_v25, %v1103_v45 }
 0xb79   :  { %v1921_v47 = vpop.eup %1920  ;;  %v1109_v48 = vmul.f32 1.442695, %v1107_v38 }
 0xb7a   :  { %v982_v49 = vsel %vm48_vm0, %v1921_v47, 0.0 }
 0xb7b   :  { %1922 = vpow2.f32 %v1109_v48  ;;  %983 = vadd.xlane.f32.xlu1 %v982_v49 }
 0xb81   :  { %v1923_v46 = vpop.eup %1922 }
 0xb82   :  { %v1113_v40 = vsel %vm48_vm0, %v1923_v46, 0.0 }
 0xb83   :  { %1114 = vadd.xlane.f32.xlu0 %v1113_v40 }
 0xb8e   :  { %v1036_v50 = vpop.xlane.xlu1 %1035 }
 0xb8f   :  { %v1040_v51 = vsub.f32 %v1030_v30, %v1036_v50 }
 0xb91   :  { %v1042_v53 = vmul.f32 1.442695, %v1040_v51 }
 0xb93   :  { %1924 = vpow2.f32 %v1042_v53 }
 0xb96   :  { %v1039_v54 = vpop.xlane.xlu2 %1038 }
 0xb97   :  { %v1041_v60 = vsub.f32 %v1032_v32, %v1039_v54 }
 0xb99   :  { %v1925_v52 = vpop.eup %1924  ;;  %v1044_v62 = vmul.f32 1.442695, %v1041_v60 }
 0xb9a   :  { %v1046_v56 = vsel %vm48_vm0, %v1925_v52, 0.0 }
 0xb9b   :  { %1047 = vadd.xlane.f32.xlu0 %v1046_v56 }
 0xb9e   :  { %v1106_v57 = vpop.xlane.xlu2 %1105 }
 0xb9f   :  { %v1108_v58 = vsub.f32 %v1099_v33, %v1106_v57 }
 0xba1   :  { %v1111_v6 = vmul.f32 1.442695, %v1108_v58 }
 0xba3   :  { %1926 = vpow2.f32 %v1111_v6 }
 0xba4   :  { %1928 = vpow2.f32 %v1044_v62 }
 0xba6   :  { %v991_v63 = vpop.permute.xlu2 %990 }
 0xba7   :  { %1003 = vmatpush.bf16.msra.mxu1 %v991_v63 }
 0xba9   :  { %v1927_v2 = vpop.eup %1926 }
 0xbaa   :  { %v1116_v3 = vsel %vm48_vm0, %v1927_v2, 0.0  ;;  %v1929_v4 = vpop.eup %1928 }
 0xbab   :  { %1117 = vadd.xlane.f32.xlu1 %v1116_v3  ;;  %v1049_v5 = vsel %vm48_vm0, %v1929_v4, 0.0 }
 0xbaf   :  { %1057 = vrot.lane.b32.xlu0 %v2341_v59, %s2003_s12 }
 0xbb3   :  { %1050 = vadd.xlane.f32.xlu1 %v1049_v5 }
 0xbcc   :  { %1124 = vrot.lane.b32.xlu1 %v2341_v59, %s2004_s13 }
 0xbe6   :  { %v981_v8 = vpop.xlane.xlu0 %980 }
 0xbe7   :  { %1930 = vrcp.f32 %v981_v8 }
 0xbed   :  { %v1931_v9 = vpop.eup %1930 }
 0xbee   :  { %v984_v11 = vpop.xlane.xlu1 %983  ;;  %v987_v12 = vmul.f32 %v1931_v9, %v1919_v42  ;;  %v1770_v42 = vld [vmem:[%s2528_s4 + $0x18] sm:$0xff] }
 0xbef   :  { %1932 = vrcp.f32 %v984_v11  ;;  %1201 = vmatpush.bf16.msra.mxu2 %v1770_v42 }
 0xbf5   :  { %v1933_v10 = vpop.eup %1932 }
 0xbf6   :  { %v988_v13 = vmul.f32 %v1933_v10, %v1921_v47  ;;  %v1115_v15 = vpop.xlane.xlu0 %1114 }
 0xbf8   :  { %v989_v14 = vpack.c.bf16 %v988_v13, %v987_v12 }
 0xbfa   :  { %1689 = vmatmul.msk.bf16.vlgmr.msra.gmra.mxu1 %vm48_vm0, %v989_v14 }
 0xc0e   :  { %v1048_v16 = vpop.xlane.xlu0 %1047 }
 0xc0f   :  { %1934 = vrcp.f32 %v1048_v16 }
 0xc15   :  { %v1935_v59 = vpop.eup %1934 }
 0xc16   :  { %v1054_v23 = vmul.f32 %v1935_v59, %v1925_v52 }
 0xc1e   :  { %v1118_v17 = vpop.xlane.xlu1 %1117 }
 0xc21   :  { %v1058_v18 = vpop.permute.xlu0 %1057 }
 0xc22   :  { %1070 = vmatpush.bf16.msra.mxu0 %v1058_v18 }
 0xc26   :  { %v1051_v19 = vpop.xlane.xlu1 %1050 }
 0xc27   :  { %1936 = vrcp.f32 %v1051_v19 }
 0xc28   :  { %1938 = vrcp.f32 %v1118_v17 }
 0xc29   :  { %1940 = vrcp.f32 %v1115_v15  ;;  %v1772_v15 = vld [vmem:[%s2529_s5 + $0x10] sm:$0xff] }
 0xc2d   :  { %v1937_v20 = vpop.eup %1936 }
 0xc2e   :  { %v1055_v0 = vmul.f32 %v1937_v20, %v1929_v4  ;;  %v1939_v25 = vpop.eup %1938 }
 0xc2f   :  { %v1941_v26 = vpop.eup %1940  ;;  %v1122_v29 = vmul.f32 %v1939_v25, %v1927_v2 }
 0xc30   :  { %v1056_v24 = vpack.c.bf16 %v1055_v0, %v1054_v23  ;;  %v1121_v30 = vmul.f32 %v1941_v26, %v1923_v46 }
 0xc32   :  { %1691 = vmatmul.msk.bf16.vlgmr.msra.gmra.mxu0 %vm48_vm0, %v1056_v24  ;;  %v1123_v1 = vpack.c.bf16 %v1122_v29, %v1121_v30 }
 0xc3e   :  { %v1125_v31 = vpop.permute.xlu1 %1124 }
 0xc3f   :  { %1137 = vmatpush.bf16.msrb.mxu1 %v1125_v31 }
 0xc42   :  { %1693 = vmatmul.msk.bf16.vlgmr.msrb.gmra.mxu1 %vm48_vm0, %v1123_v1 }
 0xc77   :  { %v1005_v32 = vpop.f32.mrf.mxu1 }
 0xc7f   :  { %v1007_v7 = vpop.f32.mrf.mxu1 }
 0xc80   :  { %v1818_v61 = vpack.i.bf16 %v1007_v7, %v1005_v32 }
 0xc82   :  { %1819 = vrot.lane.b32.xlu2 %v1818_v61, %s2005_s15 }
 0xcaf   :  { %v1072_v33 = vpop.f32.mrf.mxu0 }
 0xcb7   :  { %v1074_v35 = vpop.f32.mrf.mxu0 }
 0xcb8   :  { %v1823_v36 = vpack.i.bf16 %v1074_v35, %v1072_v33 }
 0xcba   :  { %1824 = vrot.lane.b32.xlu2 %v1823_v36, %s2006_s16 }
 0xcbf   :  { %v1139_v34 = vpop.f32.mrf.mxu1 }
 0xcc7   :  { %v1141_v37 = vpop.f32.mrf.mxu1 }
 0xcc8   :  { %v1828_v39 = vpack.i.bf16 %v1141_v37, %v1139_v34  ;;  %v1850_v34 = vld [vmem:[%s2525_s1 + $0x16] ss:$0 sm:$0xff] }
 0xcca   :  { %1829 = vrot.lane.b32.xlu0 %v1828_v39, %s2533_s21 }
 0xcdc   :  { %v1820_v43 = vpop.permute.xlu2 %1819 }
 0xcdd   :  { %v1822_v45 = vunpack.i.h.bf16 %v1820_v43  ;;  %v1821_v38 = vunpack.i.l.bf16 %v1820_v43 }
 0xcdf   :  { %v1169_v46 = vsel %vm209_vm9, %v2365_v28, %v1822_v45  ;;  %v1168_v40 = vsel %vm209_vm9, %v2363_v55, %v1821_v38  ;;  %v1849_v28 = vld [vmem:[%s2525_s1 + $0x15] ss:$0 sm:$0xff]  ;;  %v1851_v45 = vld [vmem:[%s2525_s1 + $0x17] ss:$0 sm:$0xff] }
 0xd14   :  { %v1825_v44 = vpop.permute.xlu2 %1824 }
 0xd15   :  { %v1827_v47 = vunpack.i.h.bf16 %v1825_v44  ;;  %v1826_v48 = vunpack.i.l.bf16 %v1825_v44 }
 0xd17   :  { %v1170_v53 = vsel %vm48_vm0, %v1168_v40, %v1826_v48  ;;  %v1171_v54 = vsel %vm48_vm0, %v1169_v46, %v1827_v47  ;;  %v1781_v46 = vld [vmem:[%s2528_s4 + $0xa0] sm:$0xff]  ;;  %v1780_v40 = vld [vmem:[%s2528_s4 + $0x98] sm:$0xff] }
 0xd18   :  { %1385 = vmatpush.bf16.msrb.mxu3 %v1781_v46 }
 0xd1c   :  { %1386 = vmatpush.bf16.msrb.mxu3 %v1780_v40 }
 0xd3c   :  { %v1830_v49 = vpop.permute.xlu0 %1829 }
 0xd3d   :  { %v1832_v50 = vunpack.i.h.bf16 %v1830_v49  ;;  %v1831_v51 = vunpack.i.l.bf16 %v1830_v49 }
 0xd3f   :  { %v1173_v52 = vsel %vm507_vm10, %v1171_v54, %v1832_v50  ;;  %v1172_v56 = vsel %vm507_vm10, %v1170_v53, %v1831_v51  ;;  %v1779_v50 = vld [vmem:[%s2528_s4 + $0x90] sm:$0xff]  ;;  %v1778_v51 = vld [vmem:[%s2528_s4 + $0x88] sm:$0xff]  ;;  %v1777_v53 = vld [vmem:[%s2528_s4 + $0x80] sm:$0xff] }
 0xd40   :  { %v1174_v57 = vpack.c.bf16 %v1173_v52, %v1172_v56  ;;  %1387 = vmatpush.bf16.msrb.mxu3 %v1779_v50  ;;  %v1776_v54 = vld [vmem:[%s2528_s4 + $0x78] sm:$0xff]  ;;  %v1775_v52 = vld [vmem:[%s2528_s4 + $0x70] sm:$0xff]  ;;  %v1774_v56 = vld [vmem:[%s2528_s4 + $0x68] sm:$0xff] }
 0xd42   :  { %1702 = vmatmul.msk.bf16.vlgmr.msra.gmra.mxu2 %vm76_vm1, %v1174_v57  ;;  %v1852_v57 = vld [vmem:[%s2526_s2 + $0x11] ss:$0 sm:$0xff] }
 0xd44   :  { %1388 = vmatpush.bf16.msrb.mxu3 %v1778_v51 }
 0xd48   :  { %1389 = vmatpush.bf16.msrb.mxu3 %v1777_v53 }
 0xd4c   :  { %1390 = vmatpush.bf16.msrb.mxu3 %v1776_v54 }
 0xd50   :  { %1391 = vmatpush.bf16.msrb.mxu3 %v1775_v52 }
 0xd54   :  { %1392 = vmatpush.bf16.msrb.mxu3 %v1774_v56 }
 0xdc5   :  { %v1203_v58 = vpop.f32.mrf.mxu2 }
 0xdc6   :  { %v1208_v55 = vadd.f32 %v1203_v58, %v2286_v22 }
 0xdc8   :  { %v2410_v60 = vadd.f32 %v1849_v28, %v1208_v55 }
 0xdca   :  { %v1213_v6 = vsel %vm76_vm1, %v2410_v60, 0.0  ;;  %v1221_v62 = vmul.f32 %v2410_v60, %v2410_v60 }
 0xdcb   :  { %1214 = vadd.xlane.f32.xlu2 %v1213_v6 }
 0xdcc   :  { %v1223_v63 = vsel %vm76_vm1, %v1221_v62, 0.0 }
 0xdcd   :  { %1224 = vadd.xlane.f32.xlu0 %v1223_v63  ;;  %v1205_v2 = vpop.f32.mrf.mxu2 }
 0xdce   :  { %v1209_v3 = vadd.f32 %v1205_v2, %v2294_v27  ;;  %v1773_v27 = vld [vmem:[%s2529_s5 + $0x18] sm:$0xff] }
 0xdcf   :  { %1294 = vmatpush.bf16.msrb.mxu0 %v1773_v27 }
 0xdd0   :  { %v2418_v4 = vadd.f32 %v1849_v28, %v1209_v3 }
 0xdd2   :  { %v1216_v22 = vsel %vm76_vm1, %v2418_v4, 0.0  ;;  %v1222_v5 = vmul.f32 %v2418_v4, %v2418_v4 }
 0xdd3   :  { %1217 = vadd.xlane.f32.xlu1 %v1216_v22  ;;  %1295 = vmatpush.bf16.msrb.mxu0 %v1772_v15 }
 0xdd4   :  { %v1226_v8 = vsel %vm76_vm1, %v1222_v5, 0.0 }
 0xdd5   :  { %1227 = vadd.xlane.f32.xlu2 %v1226_v8 }
 0xe3e   :  { %v1215_v11 = vpop.xlane.xlu2 %1214 }
 0xe3f   :  { %v1219_v9 = vmul.f32 %v1215_v11, %v2078_v21 }
 0xe40   :  { %v1225_v10 = vpop.xlane.xlu0 %1224 }
 0xe41   :  { %v1231_v12 = vmul.f32 %v1219_v9, %v1219_v9  ;;  %v1229_v13 = vmul.f32 %v1225_v10, %v2078_v21  ;;  %v1235_v35 = vsub.f32 %v2410_v60, %v1219_v9 }
 0xe43   :  { %v1233_v14 = vsub.f32 %v1229_v13, %v1231_v12 }
 0xe45   :  { %v1237_v16 = vadd.f32 1e-05, %v1233_v14 }
 0xe46   :  { %v1218_v17 = vpop.xlane.xlu1 %1217 }
 0xe47   :  { %1942 = vrsqrt.f32 %v1237_v16  ;;  %v1220_v18 = vmul.f32 %v1218_v17, %v2078_v21  ;;  %vm1245_vm9 = vweird.f32 %v1237_v16 }
 0xe48   :  { %v1228_v19 = vpop.xlane.xlu2 %1227 }
 0xe49   :  { %v1232_v59 = vmul.f32 %v1220_v18, %v1220_v18  ;;  %v1230_v20 = vmul.f32 %v1228_v19, %v2078_v21  ;;  %v1236_v41 = vsub.f32 %v2418_v4, %v1220_v18 }
 0xe4b   :  { %v1234_v23 = vsub.f32 %v1230_v20, %v1232_v59  ;;  %v1853_v59 = vld [vmem:[%s2525_s1 + $0x18] ss:$0 sm:$0xff] }
 0xe4d   :  { %v1943_v0 = vpop.eup %1942  ;;  %v1238_v24 = vadd.f32 1e-05, %v1234_v23 }
 0xe4e   :  { %v1240_v25 = vmul.f32 %v1943_v0, %v1237_v16  ;;  %vm1246_vm0 = vweird.f32 %v1943_v0 }
 0xe4f   :  { %1944 = vrsqrt.f32 %v1238_v24  ;;  %vm1247_vm10 = vmor %vm1245_vm9, %vm1246_vm0  ;;  %vm1255_vm12 = vweird.f32 %v1238_v24  ;;  %vm1565_vm0 = vcmask 24576  }
 0xe50   :  { %v1241_v26 = vmul.f32 %v1943_v0, %v1240_v25 }
 0xe52   :  { %v1242_v29 = vmul.f32 0.5, %v1241_v26 }
 0xe54   :  { %v1243_v30 = vsub.f32 1.5, %v1242_v29 }
 0xe55   :  { %v1945_v31 = vpop.eup %1944 }
 0xe56   :  { %v1244_v1 = vmul.f32 %v1943_v0, %v1243_v30  ;;  %v1250_v32 = vmul.f32 %v1945_v31, %v1238_v24  ;;  %vm1256_vm11 = vweird.f32 %v1945_v31 }
 0xe57   :  { %vm1257_vm13 = vmor %vm1255_vm12, %vm1256_vm11 }
 0xe58   :  { %v1251_v7 = vmul.f32 %v1945_v31, %v1250_v32  ;;  %v1248_v61 = vsel %vm1247_vm10, %v1943_v0, %v1244_v1 }
 0xe59   :  { %v1259_v37 = vmul.f32 %v1248_v61, %v1235_v35 }
 0xe5a   :  { %v1252_v33 = vmul.f32 0.5, %v1251_v7 }
 0xe5b   :  { %v1262_v43 = vmul.f32 %v1850_v34, %v1259_v37  ;;  %v1782_v37 = vld [vmem:[%s2528_s4 + $0xa8] sm:$0xff] }
 0xe5c   :  { %v1253_v36 = vsub.f32 1.5, %v1252_v33 }
 0xe5d   :  { %v1265_v47 = vadd.f32 %v1851_v45, %v1262_v43 }
 0xe5e   :  { %v1254_v39 = vmul.f32 %v1945_v31, %v1253_v36 }
 0xe60   :  { %v1258_v42 = vsel %vm1257_vm13, %v1945_v31, %v1254_v39 }
 0xe61   :  { %v1260_v44 = vmul.f32 %v1258_v42, %v1236_v41 }
 0xe63   :  { %v1263_v38 = vmul.f32 %v1850_v34, %v1260_v44  ;;  %v1783_v34 = vld [vmem:[%s2528_s4 + $0xb0] sm:$0xff] }
 0xe64   :  { %1484 = vmatpush.bf16.msra.mxu1 %v1783_v34 }
 0xe65   :  { %v1266_v48 = vadd.f32 %v1851_v45, %v1263_v38 }
 0xe67   :  { %v1267_v49 = vpack.c.bf16 %v1266_v48, %v1265_v47 }
 0xe68   :  { %1485 = vmatpush.bf16.msra.mxu1 %v1782_v37 }
 0xe69   :  { %1711 = vmatmul.msk.bf16.vlgmr.msrb.gmra.mxu0 %vm76_vm1, %v1267_v49 }
 0xee6   :  { %v1297_v28 = vpop.f32.mrf.mxu0 }
 0xee7   :  { %v1298_v58 = vadd.f32 %v1852_v57, %v1297_v28 }
 0xee9   :  { %v1304_v55 = vmul.f32 0.044715, %v1298_v58  ;;  %v1302_v14 = vmul.f32 0.5, %v1298_v58 }
 0xeeb   :  { %v1306_v6 = vmul.f32 %v1304_v55, %v1298_v58 }
 0xeed   :  { %v1308_v62 = vmul.f32 %v1306_v6, %v1298_v58 }
 0xeee   :  { %v1299_v63 = vpop.f32.mrf.mxu0 }
 0xeef   :  { %v1310_v2 = vadd.f32 %v1308_v62, %v1298_v58  ;;  %v1300_v3 = vadd.f32 %v1852_v57, %v1299_v63 }
 0xef1   :  { %v1305_v22 = vmul.f32 0.044715, %v1300_v3  ;;  %v1312_v5 = vmul.f32 0.7978846, %v1310_v2  ;;  %v1303_v15 = vmul.f32 0.5, %v1300_v3 }
 0xef3   :  { %v1307_v8 = vmul.f32 %v1305_v22, %v1300_v3  ;;  %1946 = vtanh.f32 %v1312_v5  ;;  %v1855_v22 = vld [vmem:[%s2525_s1 + $0x2] ss:$0 sm:$0xff] }
 0xef5   :  { %v1309_v11 = vmul.f32 %v1307_v8, %v1300_v3 }
 0xef7   :  { %v1311_v9 = vadd.f32 %v1309_v11, %v1300_v3 }
 0xef9   :  { %v1313_v10 = vmul.f32 0.7978846, %v1311_v9  ;;  %v1947_v12 = vpop.eup %1946 }
 0xefa   :  { %v1316_v13 = vadd.f32 1.0, %v1947_v12 }
 0xefb   :  { %1948 = vtanh.f32 %v1313_v10  ;;  %v2008_v10 = vmov 8.0  }
 0xefc   :  { %v1318_v17 = vmul.f32 %v1316_v13, %v1302_v14 }
 0xf01   :  { %v1949_v27 = vpop.eup %1948 }
 0xf02   :  { %v1317_v16 = vadd.f32 1.0, %v1949_v27 }
 0xf04   :  { %v1319_v18 = vmul.f32 %v1317_v16, %v1303_v15 }
 0xf06   :  { %v1320_v19 = vpack.c.bf16 %v1319_v18, %v1318_v17 }
 0xf08   :  { %1393 = vmatmul.bf16.vlgmr.msrb.gmra.mxu3 %v1320_v19 }
 0xf8b   :  { %v1394_v20 = vpop.f32.mrf.mxu3 }
 0xf8c   :  { %v1399_v23 = vadd.f32 %v1394_v20, %v2410_v60 }
 0xf8e   :  { %v1402_v0 = vadd.f32 %v1853_v59, %v1399_v23 }
 0xf90   :  { %v1404_v24 = vsel %vm76_vm1, %v1402_v0, 0.0  ;;  %v1412_v25 = vmul.f32 %v1402_v0, %v1402_v0 }
 0xf91   :  { %1405 = vadd.xlane.f32.xlu1 %v1404_v24 }
 0xf92   :  { %v1414_v26 = vsel %vm76_vm1, %v1412_v25, 0.0 }
 0xf93   :  { %1415 = vadd.xlane.f32.xlu2 %v1414_v26  ;;  %v1396_v29 = vpop.f32.mrf.mxu3 }
 0xf94   :  { %v1400_v30 = vadd.f32 %v1396_v29, %v2418_v4 }
 0xf96   :  { %v1403_v31 = vadd.f32 %v1853_v59, %v1400_v30  ;;  %v1856_v30 = vld [vmem:[%s2525_s1 + $0x3] ss:$0 sm:$0xff] }
 0xf98   :  { %v1407_v1 = vsel %vm76_vm1, %v1403_v31, 0.0  ;;  %v1413_v32 = vmul.f32 %v1403_v31, %v1403_v31 }
 0xf99   :  { %1408 = vadd.xlane.f32.xlu0 %v1407_v1 }
 0xf9a   :  { %v1417_v7 = vsel %vm76_vm1, %v1413_v32, 0.0 }
 0xf9b   :  { %1418 = vadd.xlane.f32.xlu1 %v1417_v7 }
0x1004   :  { %v1406_v60 = vpop.xlane.xlu1 %1405 }
0x1005   :  { %v1410_v61 = vmul.f32 %v1406_v60, %v2078_v21 }
0x1006   :  { %v1416_v33 = vpop.xlane.xlu2 %1415 }
0x1007   :  { %v1422_v35 = vmul.f32 %v1410_v61, %v1410_v61  ;;  %v1420_v36 = vmul.f32 %v1416_v33, %v2078_v21  ;;  %v1426_v28 = vsub.f32 %v1402_v0, %v1410_v61 }
0x1009   :  { %v1424_v4 = vsub.f32 %v1420_v36, %v1422_v35 }
0x100b   :  { %v1428_v39 = vadd.f32 1e-05, %v1424_v4 }
0x100c   :  { %v1409_v41 = vpop.xlane.xlu0 %1408 }
0x100d   :  { %1950 = vrsqrt.f32 %v1428_v39  ;;  %v1411_v42 = vmul.f32 %v1409_v41, %v2078_v21  ;;  %vm1436_vm15 = vweird.f32 %v1428_v39 }
0x100e   :  { %v1419_v43 = vpop.xlane.xlu1 %1418 }
0x100f   :  { %v1423_v44 = vmul.f32 %v1411_v42, %v1411_v42  ;;  %v1421_v45 = vmul.f32 %v1419_v43, %v2078_v21  ;;  %v1854_v21 = vld [vmem:[%s2525_s1 + $0x1] ss:$0 sm:$0xff]  ;;  %v1427_v62 = vsub.f32 %v1403_v31, %v1411_v42  ;;  %v1857_v31 = vld [vmem:[%s2525_s1 + $0x4] ss:$0 sm:$0xff]  ;;  %v2009_v43 = vmov 14.0  }
0x1011   :  { %v1425_v38 = vsub.f32 %v1421_v45, %v1423_v44 }
0x1013   :  { %v1951_v47 = vpop.eup %1950  ;;  %v1429_v48 = vadd.f32 1e-05, %v1425_v38 }
0x1014   :  { %v1431_v49 = vmul.f32 %v1951_v47, %v1428_v39  ;;  %vm1437_vm14 = vweird.f32 %v1951_v47 }
0x1015   :  { %1952 = vrsqrt.f32 %v1429_v48  ;;  %vm1438_vm2 = vmor %vm1436_vm15, %vm1437_vm14  ;;  %vm1446_vm4 = vweird.f32 %v1429_v48 }
0x1016   :  { %v1432_v46 = vmul.f32 %v1951_v47, %v1431_v49  ;;  %1954 = vrcp.f32 %v2008_v10 }
0x1017   :  { %1956 = vrcp.f32 %v2009_v43 }
0x1018   :  { %v1433_v40 = vmul.f32 0.5, %v1432_v46 }
0x101a   :  { %v1434_v50 = vsub.f32 1.5, %v1433_v40 }
0x101b   :  { %v1953_v51 = vpop.eup %1952 }
0x101c   :  { %v1435_v53 = vmul.f32 %v1951_v47, %v1434_v50  ;;  %v1441_v54 = vmul.f32 %v1953_v51, %v1429_v48  ;;  %vm1447_vm3 = vweird.f32 %v1953_v51  ;;  %v1955_v12 = vpop.eup %1954 }
0x101d   :  { %vm1448_vm5 = vmor %vm1446_vm4, %vm1447_vm3  ;;  %v1501_v13 = vmul.f32 8.0, %v1955_v12  ;;  %vm1505_vm7 = vweird.f32 %v1955_v12  ;;  %v1957_v50 = vpop.eup %1956 }
0x101e   :  { %v1442_v52 = vmul.f32 %v1953_v51, %v1441_v54  ;;  %v1439_v56 = vsel %vm1438_vm2, %v1951_v47, %v1435_v53  ;;  %vm1562_vm8 = vweird.f32 %v1957_v50 }
0x101f   :  { %v1450_v55 = vmul.f32 %v1439_v56, %v1426_v28  ;;  %v1502_v27 = vsub.f32 1.0, %v1501_v13 }
0x1020   :  { %v1443_v57 = vmul.f32 0.5, %v1442_v52 }
0x1021   :  { %v1453_v2 = vmul.f32 %v1854_v21, %v1450_v55  ;;  %v1503_v17 = vmul.f32 %v1955_v12, %v1502_v27 }
0x1022   :  { %v1444_v58 = vsub.f32 1.5, %v1443_v57 }
0x1023   :  { %v1456_v8 = vadd.f32 %v1855_v22, %v1453_v2  ;;  %v1504_v59 = vadd.f32 %v1955_v12, %v1503_v17 }
0x1024   :  { %v1445_v6 = vmul.f32 %v1953_v51, %v1444_v58  ;;  %v1558_v58 = vmul.f32 14.0, %v1957_v50 }
0x1025   :  { %v1506_v26 = vsel %vm1505_vm7, %v1955_v12, %v1504_v59 }
0x1026   :  { %v1449_v63 = vsel %vm1448_vm5, %v1953_v51, %v1445_v6  ;;  %v1858_v6 = vld [vmem:[%s2525_s1 + $0x6] ss:$0 sm:$0xff] }
0x1027   :  { %v1451_v3 = vmul.f32 %v1449_v63, %v1427_v62  ;;  %v1559_v63 = vsub.f32 1.0, %v1558_v58 }
0x1029   :  { %v1454_v5 = vmul.f32 %v1854_v21, %v1451_v3  ;;  %v1560_v12 = vmul.f32 %v1957_v50, %v1559_v63 }
0x102b   :  { %v1457_v11 = vadd.f32 %v1855_v22, %v1454_v5  ;;  %v1859_v22 = vld [vmem:[%s2525_s1 + $0x5] ss:$0 sm:$0xff]  ;;  %s2010_s1 = smov [#allocation2]  }
0x102c   :  { %s1592_s30 = sshll.u32 %s2010_s1, 4  ;;  %s1593_s30 = int_to_ptr.vmem [resolvable:$true] %s1592_s30 }
0x102d   :  { %v1458_v9 = vpack.c.bf16 %v1457_v11, %v1456_v8 }
0x102f   :  { %1752 = vmatmul.msk.bf16.vlgmr.msra.gmra.mxu1 %vm76_vm1, %v1458_v9  ;;  %vm1532_vm1 = vcmask 30720  }
0x10ac   :  { %v1487_v14 = vpop.f32.mrf.mxu1 }
0x10ad   :  { %v1493_v15 = vsel %vm1492_vm6, %v1487_v14, 0.0  ;;  %v1517_v60 = vmul.f32 %v1856_v30, %v1487_v14 }
0x10ae   :  { %v1494_v16 = vrot.slane %v1493_v15, 4 }
0x10b0   :  { %v1495_v18 = vadd.f32 %v1494_v16, %v1493_v15  ;;  %v1561_v16 = vadd.f32 %v1957_v50, %v1560_v12 }
0x10b2   :  { %v1496_v19 = vrot.slane %v1495_v18, 2 }
0x10b4   :  { %v1497_v20 = vadd.f32 %v1496_v19, %v1495_v18  ;;  %v1489_v23 = vpop.f32.mrf.mxu1 }
0x10b5   :  { %v1508_v0 = vsel %vm1492_vm6, %v1489_v23, 0.0  ;;  %v1518_v45 = vmul.f32 %v1856_v30, %v1489_v23  ;;  %v1563_v23 = vsel %vm1562_vm8, %v1957_v50, %v1561_v16 }
0x10b6   :  { %v1498_v24 = vrot.slane %v1497_v20, 1  ;;  %v1509_v25 = vrot.slane %v1508_v0, 4 }
0x10b8   :  { %v1499_v29 = vadd.f32 %v1498_v24, %v1497_v20  ;;  %v1510_v1 = vadd.f32 %v1509_v25, %v1508_v0 }
0x10ba   :  { %v1507_v32 = vmul.f32 %v1506_v26, %v1499_v29  ;;  %v1511_v7 = vrot.slane %v1510_v1, 2 }
0x10bc   :  { %v1520_v61 = vmul.f32 %v1857_v31, %v1507_v32  ;;  %v1512_v33 = vadd.f32 %v1511_v7, %v1510_v1 }
0x10be   :  { %v1522_v35 = vadd.f32 %v1520_v61, %v1517_v60  ;;  %v1513_v36 = vrot.slane %v1512_v33, 1 }
0x10c0   :  { %v1525_v34 = vrot.slane %v1522_v35, 7  ;;  %v1567_v4 = vmul.f32 -1.0, %v1522_v35  ;;  %v1514_v37 = vadd.f32 %v1513_v36, %v1512_v33 }
0x10c2   :  { %v1527_v39 = vsub.f32 %v1522_v35, %v1525_v34  ;;  %v1569_v41 = vmul.f32 1.442695, %v1567_v4  ;;  %v1515_v42 = vmul.f32 %v1514_v37, %v1506_v26 }
0x10c4   :  { %v1528_v44 = vand.u32 2147483647, %v1527_v39  ;;  %1958 = vpow2.f32 %v1569_v41  ;;  %v1521_v38 = vmul.f32 %v1857_v31, %v1515_v42 }
0x10c6   :  { %v1530_v47 = vrot.slane %v1528_v44, 1  ;;  %v1523_v48 = vadd.f32 %v1521_v38, %v1518_v45 }
0x10c8   :  { %v1533_v49 = vsel %vm1532_vm1, %v1530_v47, 0.0  ;;  %v1542_v46 = vrot.slane %v1523_v48, 7  ;;  %v1568_v40 = vmul.f32 -1.0, %v1523_v48 }
0x10c9   :  { %v1534_v51 = vrot.slane %v1533_v49, 4 }
0x10ca   :  { %v1959_v53 = vpop.eup %1958  ;;  %v1544_v54 = vsub.f32 %v1523_v48, %v1542_v46  ;;  %v1571_v52 = vmul.f32 1.442695, %v1568_v40 }
0x10cb   :  { %v1573_v56 = vadd.f32 1.0, %v1959_v53  ;;  %v1535_v57 = vadd.f32 %v1534_v51, %v1533_v49 }
0x10cc   :  { %v1545_v28 = vand.u32 2147483647, %v1544_v54  ;;  %1960 = vpow2.f32 %v1571_v52 }
0x10cd   :  { %1962 = vrcp.f32 %v1573_v56  ;;  %v1536_v55 = vrot.slane %v1535_v57, 2 }
0x10ce   :  { %v1547_v21 = vrot.slane %v1545_v28, 1 }
0x10cf   :  { %v1537_v9 = vadd.f32 %v1536_v55, %v1535_v57 }
0x10d0   :  { %v1549_v62 = vsel %vm1532_vm1, %v1547_v21, 0.0 }
0x10d1   :  { %v1550_v2 = vrot.slane %v1549_v62, 4  ;;  %v1538_v14 = vrot.slane %v1537_v9, 1 }
0x10d2   :  { %v1961_v3 = vpop.eup %1960 }
0x10d3   :  { %v1963_v5 = vpop.eup %1962  ;;  %v1551_v8 = vadd.f32 %v1550_v2, %v1549_v62  ;;  %v1574_v11 = vadd.f32 1.0, %v1961_v3  ;;  %v1539_v19 = vadd.f32 %v1538_v14, %v1537_v9 }
0x10d4   :  { %v1578_v10 = vmul.f32 %v1963_v5, %v1858_v6 }
0x10d5   :  { %v1552_v13 = vrot.slane %v1551_v8, 2  ;;  %1964 = vrcp.f32 %v1574_v11 }
0x10d6   :  { %v1581_v27 = vadd.f32 %v1859_v22, %v1578_v10 }
0x10d7   :  { %v1553_v15 = vadd.f32 %v1552_v13, %v1551_v8 }
0x10d8   :  { %1583 = vst.msk [vmem:[%s2530_s6] sm:$0xff] %vm1492_vm6, %v1581_v27 }
0x10d9   :  { %v1554_v17 = vrot.slane %v1553_v15, 1 }
0x10db   :  { %v1965_v18 = vpop.eup %1964  ;;  %v1555_v59 = vadd.f32 %v1554_v17, %v1553_v15 }
0x10dc   :  { %v1579_v20 = vmul.f32 %v1965_v18, %v1858_v6 }
0x10dd   :  { %v1556_v0 = vadd.f32 %v1555_v59, %v1539_v19 }
0x10de   :  { %v1582_v24 = vadd.f32 %v1859_v22, %v1579_v20 }
0x10df   :  { %v1564_v25 = vmul.f32 %v1563_v23, %v1556_v0 }
0x10e0   :  { %1584 = vst.msk [vmem:[%s2530_s6 + $0x8] sm:$0xff] %vm1492_vm6, %v1582_v24 }
0x10e1   :  { %1566 = vst.msk [vmem:[#allocation2] sm:$0x1] %vm1565_vm0, %v1564_v25 }
0x10e2   :  { %1597 = dma.vmem_to_hbm [thread:$0]  %s1593_s30, 16, %s1595_s24, [#allocation3]  }
0x10e3   :  { %1990 = dma.done.wait [#allocation3], 16  }
0x10e4   :  { %1991 = vsyncadd [#allocation3], 4294967280 }
0x10e5   :  { %1604 = vsyncpa [#allocation3], 1 }

</bundles_post_ra>
